<compile_context>
chip_gen: v5e
topology: v5e:2x2
jax: 0.10.0
libtpu: 0.0.40
codegen_flags: <defaults>
</compile_context>

<pallas_src>
import functools

import jax
import jax.numpy as jnp
from jax.experimental import pallas as pl
from jax.experimental.pallas import tpu as pltpu

_OUT_WIDTH = 256     # packed output lanes (2 f32 vregs wide)
_OUT_A_LANE = 32     # a40 lives at lanes 32:72 of the packed output
_OUT_B_LANE = 128    # b   lives at lanes 128:168 (vreg boundary -> no shift)


def _round_up(x, m):
    return (x + m - 1) // m * m


def _trunk_act_dtype():
    """bf16 bias-add/ReLU on chips with a bf16 VPU (v6e/v7x); f32 on v5e-."""
    try:
        kind = jax.devices()[0].device_kind.lower()
    except Exception:
        return jnp.bfloat16
    if any(g in kind for g in ("v2", "v3", "v4", "v5")):
        return jnp.float32
    return jnp.bfloat16


def _ctp_kernel(ctx_ref, f_ref,
                w1, b1, w2, b2, w3, b3, w4, b4, w5, b5,
                wab, bab, wn1, bn1, wn2, bn2,
                out_ref, *, act_dtype):
    bt = out_ref.shape[0]

    def mxu(x_bf16, w_ref):
        # bf16 MXU operands, f32 accumulation.
        return jnp.dot(x_bf16, w_ref[...], preferred_element_type=jnp.float32)

    # --- self.net: 5x (Linear + ReLU) -------------------------------------
    # One f32->act_dtype cast per layer; bias-add + ReLU at act_dtype width,
    # next dot fed in bf16 with no extra cast.
    h = ctx_ref[...]                                            # (bt, latent) bf16
    for w, b in ((w1, b1), (w2, b2), (w3, b3), (w4, b4), (w5, b5)):
        acc = mxu(h, w).astype(act_dtype)
        h = jnp.maximum(acc + b[...].astype(act_dtype), 0).astype(jnp.bfloat16)

    # --- fused head: one (H, 72) matmul ------------------------------------
    # cols 0:32 = b_linear (pre-ReLU), cols 32:72 = a_linear replicated 40x
    # (torch's a.expand(B, 40) folded into the MXU).
    ab = mxu(h, wab) + bab[...]                                 # (bt, 72) f32
    bl = jnp.maximum(ab[:, 0:32], 0.0).astype(jnp.bfloat16)     # b_linear + ReLU

    # --- b = b_net(cat((bl, f), dim=1)): single K = 72 matmul (bf16 cat) ----
    cat = jnp.concatenate([bl, f_ref[...]], axis=1)             # (bt, 72) bf16
    acc = mxu(cat, wn1).astype(act_dtype)
    bh = jnp.maximum(acc + bn1[...].astype(act_dtype), 0).astype(jnp.bfloat16)
    bvec = mxu(bh, wn2) + bn2[...]                              # (bt, 40) f32

    # --- lane-dense (bt, 256) store, no cross-lane shifts -------------------
    #   lanes   0:72  = ab   (a40 already at 32:72; lanes 0:32 are scratch)
    #   lanes 128:168 = bvec (starts at a vreg boundary)
    pad0 = jnp.zeros((bt, _OUT_B_LANE - ab.shape[1]), jnp.float32)
    pad1 = jnp.zeros((bt, _OUT_WIDTH - _OUT_B_LANE - bvec.shape[1]), jnp.float32)
    out_ref[...] = jnp.concatenate([ab, pad0, bvec, pad1], axis=1)


def context_to_params(t, f, context, params, *, bt_max=512):
    """Pallas equivalent of ContextToParams.forward(t, f, context)."""
    del t  # `t` is unused in the PyTorch forward as well
    B, latent_dim = context.shape
    x_dim = f.shape[1]
    # forward hard-codes a.expand(B, 40) and stacks it with b (shape (B, x_dim))
    assert x_dim == 40, f"x_dim must be 40 to match a.expand(B, 40); got {x_dim}"

    # Fixed batch tile + cdiv grid (pad the tail): grid >= 2 once B >= 2*bt so
    # both v7x TCs get work; per-tile footprint is bounded for any B.
    bt = max(8, min(bt_max, _round_up((B + 1) // 2, 8)))
    B_pad = _round_up(B, bt)
    grid = (B_pad // bt,)

    ctx_b = context.astype(jnp.bfloat16)
    f_b = f.astype(jnp.bfloat16)
    if B_pad != B:
        ctx_b = jnp.pad(ctx_b, ((0, B_pad - B), (0, 0)))
        f_b = jnp.pad(f_b, ((0, B_pad - B), (0, 0)))

    ins = (
        ctx_b, f_b,
        params["w1"], params["b1"], params["w2"], params["b2"],
        params["w3"], params["b3"], params["w4"], params["b4"],
        params["w5"], params["b5"],
        params["wab"], params["bab"],
        params["wn1"], params["bn1"],
        params["wn2"], params["bn2"],
    )

    def row_spec(cols):
        return pl.BlockSpec((bt, cols), lambda i: (i, 0))

    def const_spec(shape):
        nd = len(shape)
        return pl.BlockSpec(shape, lambda i: (0,) * nd)

    in_specs = ([row_spec(latent_dim), row_spec(x_dim)]
                + [const_spec(p.shape) for p in ins[2:]])
    out_specs = pl.BlockSpec((bt, _OUT_WIDTH), lambda i: (i, 0))

    flops = 2 * B_pad * sum(int(params[k].shape[0]) * int(params[k].shape[1])
                            for k in ("w1", "w2", "w3", "w4", "w5",
                                      "wab", "wn1", "wn2"))
    bytes_accessed = (sum(int(v.size) * v.dtype.itemsize for v in ins)
                      + B_pad * _OUT_WIDTH * 4)

    kernel = functools.partial(_ctp_kernel, act_dtype=_trunk_act_dtype())

    packed = pl.pallas_call(
        kernel,
        grid=grid,
        in_specs=in_specs,
        out_specs=out_specs,
        out_shape=jax.ShapeDtypeStruct((B_pad, _OUT_WIDTH), jnp.float32),
        compiler_params=pltpu.CompilerParams(dimension_semantics=("parallel",)),
        cost_estimate=pl.CostEstimate(flops=flops, transcendentals=0,
                                      bytes_accessed=bytes_accessed),
    )(*ins)

    # torch.stack((a, b), dim=2): pure layout glue, done outside the kernel.
    a_out = packed[:B, _OUT_A_LANE:_OUT_A_LANE + 40]
    b_out = packed[:B, _OUT_B_LANE:_OUT_B_LANE + x_dim]
    return jnp.stack((a_out, b_out), axis=2)                    # (B, 40, 2)


def init_params(key, latent_dim, hidden_dim, x_dim):
    """PyTorch-style (uniform +-1/sqrt(fan_in)) init; weights stored bf16."""
    keys = iter(jax.random.split(key, 40))

    def linear(in_d, out_d):
        lim = 1.0 / (in_d ** 0.5)
        w = jax.random.uniform(next(keys), (in_d, out_d), jnp.float32, -lim, lim)
        b = jax.random.uniform(next(keys), (1, out_d), jnp.float32, -lim, lim)
        return w, b

    p = {}
    for i in range(1, 6):
        in_d = latent_dim if i == 1 else hidden_dim
        w, b = linear(in_d, hidden_dim)
        p[f"w{i}"] = w.astype(jnp.bfloat16)
        p[f"b{i}"] = b.astype(jnp.bfloat16)      # bias-add runs at trunk act dtype
    wbl, bbl = linear(hidden_dim, 32)            # b_linear[0]
    wa, ba = linear(hidden_dim, 1)               # a_linear
    # fused head: cols 0:32 = b_linear, cols 32:72 = a_linear replicated 40x
    # (folds a.expand(B, 40) into the matmul; identical columns -> identical values)
    p["wab"] = jnp.concatenate([wbl, jnp.tile(wa, (1, 40))],
                               axis=1).astype(jnp.bfloat16)     # (H, 72)
    p["bab"] = jnp.concatenate([bbl, jnp.tile(ba, (1, 40))], axis=1)  # (1, 72) f32
    wn1, bn1 = linear(32 + x_dim, 256)           # b_net[0] (single K=72 weight)
    p["wn1"] = wn1.astype(jnp.bfloat16)
    p["bn1"] = bn1.astype(jnp.bfloat16)
    wn2, bn2 = linear(256, x_dim)                # b_net[2]
    p["wn2"] = wn2.astype(jnp.bfloat16)
    p["bn2"] = bn2                               # (1, 40) f32 (output path)
    return p


def _reference(f, context, params):
    """Pure-JAX reference using the same bf16 weights (validates structure)."""
    def dot(x, w):
        return jnp.dot(x.astype(jnp.bfloat16), w, preferred_element_type=jnp.float32)

    h = context.astype(jnp.float32)
    for i in range(1, 6):
        h = jnp.maximum(dot(h, params[f"w{i}"]) + params[f"b{i}"].astype(jnp.float32), 0.0)
    ab = dot(h, params["wab"]) + params["bab"]
    bl = jnp.maximum(ab[:, 0:32], 0.0)
    a40 = ab[:, 32:72]
    cat = jnp.concatenate([bl, f.astype(jnp.float32)], axis=1)
    bh = jnp.maximum(dot(cat, params["wn1"]) + params["bn1"].astype(jnp.float32), 0.0)
    b = dot(bh, params["wn2"]) + params["bn2"]
    return jnp.stack((a40, b), axis=2)


if __name__ == "__main__":
    # x_dim must be 40 (the forward hard-codes a.expand(B, 40) then stacks with b).
    latent_dim, hidden_dim, x_dim = 16, 256, 40

    key = jax.random.PRNGKey(0)
    kp, kc, kf = jax.random.split(key, 3)
    params = init_params(kp, latent_dim, hidden_dim, x_dim)

    # Case 1: small demo batch (single grid step).
    B = 8
    context = jax.random.normal(kc, (B, latent_dim), jnp.float32)
    f = jax.random.normal(kf, (B, x_dim), jnp.float32)
    t = jnp.zeros((B, 1), jnp.float32)  # unused by forward, kept for signature parity

    res = context_to_params(t, f, context, params)
    jax.block_until_ready(res)
    assert res.shape == (B, 40, 2), res.shape
    err = float(jnp.max(jnp.abs(res - _reference(f, context, params))))
    assert err < 5e-2, f"max abs error vs reference (B=8): {err}"

    # Case 2: non-multiple batch -> exercises the padded cdiv grid (grid > 1).
    B2 = 40
    kc2, kf2 = jax.random.split(jax.random.PRNGKey(1))
    context2 = jax.random.normal(kc2, (B2, latent_dim), jnp.float32)
    f2 = jax.random.normal(kf2, (B2, x_dim), jnp.float32)
    t2 = jnp.zeros((B2, 1), jnp.float32)

    res2 = context_to_params(t2, f2, context2, params)
    jax.block_until_ready(res2)
    assert res2.shape == (B2, 40, 2), res2.shape
    err2 = float(jnp.max(jnp.abs(res2 - _reference(f2, context2, params))))
    assert err2 < 5e-2, f"max abs error vs reference (B=40): {err2}"

    print("KERNEL_OK")
</pallas_src>

<mosaic_0001>
module attributes {stable_mosaic.version = 11 : i64} {
  func.func @_ctp_kernel(%arg0: i32, %arg1: memref<8x16xbf16, #tpu.memory_space<vmem>>, %arg2: memref<8x40xbf16, #tpu.memory_space<vmem>>, %arg3: memref<16x256xbf16, #tpu.memory_space<vmem>>, %arg4: memref<1x256xbf16, #tpu.memory_space<vmem>>, %arg5: memref<256x256xbf16, #tpu.memory_space<vmem>>, %arg6: memref<1x256xbf16, #tpu.memory_space<vmem>>, %arg7: memref<256x256xbf16, #tpu.memory_space<vmem>>, %arg8: memref<1x256xbf16, #tpu.memory_space<vmem>>, %arg9: memref<256x256xbf16, #tpu.memory_space<vmem>>, %arg10: memref<1x256xbf16, #tpu.memory_space<vmem>>, %arg11: memref<256x256xbf16, #tpu.memory_space<vmem>>, %arg12: memref<1x256xbf16, #tpu.memory_space<vmem>>, %arg13: memref<256x72xbf16, #tpu.memory_space<vmem>>, %arg14: memref<1x72xf32, #tpu.memory_space<vmem>>, %arg15: memref<72x256xbf16, #tpu.memory_space<vmem>>, %arg16: memref<1x256xbf16, #tpu.memory_space<vmem>>, %arg17: memref<256x40xbf16, #tpu.memory_space<vmem>>, %arg18: memref<1x40xf32, #tpu.memory_space<vmem>>, %arg19: memref<8x256xf32, #tpu.memory_space<vmem>>) attributes {dimension_semantics = [#tpu.dimension_semantics<parallel>], iteration_bounds = array<i64: 1>, scalar_prefetch = 0 : i64, scratch_operands = 0 : i64, tpu.core_type = #tpu.core_type<tc>, window_params = [{transform_indices = @transform_0, window_bounds = array<i64: 8, 16>}, {transform_indices = @transform_1, window_bounds = array<i64: 8, 40>}, {pipeline_mode = #tpu.pipeline_mode<synchronous>, transform_indices = @transform_2, window_bounds = array<i64: 16, 256>}, {pipeline_mode = #tpu.pipeline_mode<synchronous>, transform_indices = @transform_3, window_bounds = array<i64: 1, 256>}, {pipeline_mode = #tpu.pipeline_mode<synchronous>, transform_indices = @transform_4, window_bounds = array<i64: 256, 256>}, {pipeline_mode = #tpu.pipeline_mode<synchronous>, transform_indices = @transform_5, window_bounds = array<i64: 1, 256>}, {pipeline_mode = #tpu.pipeline_mode<synchronous>, transform_indices = @transform_6, window_bounds = array<i64: 256, 256>}, {pipeline_mode = #tpu.pipeline_mode<synchronous>, transform_indices = @transform_7, window_bounds = array<i64: 1, 256>}, {pipeline_mode = #tpu.pipeline_mode<synchronous>, transform_indices = @transform_8, window_bounds = array<i64: 256, 256>}, {pipeline_mode = #tpu.pipeline_mode<synchronous>, transform_indices = @transform_9, window_bounds = array<i64: 1, 256>}, {pipeline_mode = #tpu.pipeline_mode<synchronous>, transform_indices = @transform_10, window_bounds = array<i64: 256, 256>}, {pipeline_mode = #tpu.pipeline_mode<synchronous>, transform_indices = @transform_11, window_bounds = array<i64: 1, 256>}, {pipeline_mode = #tpu.pipeline_mode<synchronous>, transform_indices = @transform_12, window_bounds = array<i64: 256, 72>}, {pipeline_mode = #tpu.pipeline_mode<synchronous>, transform_indices = @transform_13, window_bounds = array<i64: 1, 72>}, {pipeline_mode = #tpu.pipeline_mode<synchronous>, transform_indices = @transform_14, window_bounds = array<i64: 72, 256>}, {pipeline_mode = #tpu.pipeline_mode<synchronous>, transform_indices = @transform_15, window_bounds = array<i64: 1, 256>}, {pipeline_mode = #tpu.pipeline_mode<synchronous>, transform_indices = @transform_16, window_bounds = array<i64: 256, 40>}, {pipeline_mode = #tpu.pipeline_mode<synchronous>, transform_indices = @transform_17, window_bounds = array<i64: 1, 40>}, {transform_indices = @transform_18, window_bounds = array<i64: 8, 256>}]} {
    %c0 = arith.constant 0 : index
    %c0_0 = arith.constant 0 : index
    %0 = vector.load %arg1[%c0, %c0_0] : memref<8x16xbf16, #tpu.memory_space<vmem>>, vector<8x16xbf16>
    %c0_1 = arith.constant 0 : index
    %c0_2 = arith.constant 0 : index
    %1 = vector.load %arg3[%c0_1, %c0_2] : memref<16x256xbf16, #tpu.memory_space<vmem>>, vector<16x256xbf16>
    %cst = arith.constant dense<0.000000e+00> : vector<8x256xf32>
    %2 = tpu.matmul %0, %1, %cst {dimension_numbers = #tpu.dot_dimension_numbers<[1], [0], [0], [1], [0, 0, 1, 1], [], []>} : vector<8x16xbf16>, vector<16x256xbf16>, vector<8x256xf32> -> vector<8x256xf32>
    %3 = arith.truncf %2 : vector<8x256xf32> to vector<8x256xbf16>
    %c0_3 = arith.constant 0 : index
    %c0_4 = arith.constant 0 : index
    %4 = vector.load %arg4[%c0_3, %c0_4] : memref<1x256xbf16, #tpu.memory_space<vmem>>, vector<1x256xbf16>
    %5 = vector.broadcast %4 : vector<1x256xbf16> to vector<8x256xbf16>
    %6 = arith.addf %3, %5 : vector<8x256xbf16>
    %cst_5 = arith.constant 0.000000e+00 : bf16
    %7 = vector.broadcast %cst_5 : bf16 to vector<8x256xbf16>
    %8 = arith.maximumf %6, %7 : vector<8x256xbf16>
    %c0_6 = arith.constant 0 : index
    %c0_7 = arith.constant 0 : index
    %9 = vector.load %arg5[%c0_6, %c0_7] : memref<256x256xbf16, #tpu.memory_space<vmem>>, vector<256x256xbf16>
    %cst_8 = arith.constant dense<0.000000e+00> : vector<8x256xf32>
    %10 = tpu.matmul %8, %9, %cst_8 {dimension_numbers = #tpu.dot_dimension_numbers<[1], [0], [0], [1], [0, 0, 1, 1], [], []>} : vector<8x256xbf16>, vector<256x256xbf16>, vector<8x256xf32> -> vector<8x256xf32>
    %11 = arith.truncf %10 : vector<8x256xf32> to vector<8x256xbf16>
    %c0_9 = arith.constant 0 : index
    %c0_10 = arith.constant 0 : index
    %12 = vector.load %arg6[%c0_9, %c0_10] : memref<1x256xbf16, #tpu.memory_space<vmem>>, vector<1x256xbf16>
    %13 = vector.broadcast %12 : vector<1x256xbf16> to vector<8x256xbf16>
    %14 = arith.addf %11, %13 : vector<8x256xbf16>
    %cst_11 = arith.constant 0.000000e+00 : bf16
    %15 = vector.broadcast %cst_11 : bf16 to vector<8x256xbf16>
    %16 = arith.maximumf %14, %15 : vector<8x256xbf16>
    %c0_12 = arith.constant 0 : index
    %c0_13 = arith.constant 0 : index
    %17 = vector.load %arg7[%c0_12, %c0_13] : memref<256x256xbf16, #tpu.memory_space<vmem>>, vector<256x256xbf16>
    %cst_14 = arith.constant dense<0.000000e+00> : vector<8x256xf32>
    %18 = tpu.matmul %16, %17, %cst_14 {dimension_numbers = #tpu.dot_dimension_numbers<[1], [0], [0], [1], [0, 0, 1, 1], [], []>} : vector<8x256xbf16>, vector<256x256xbf16>, vector<8x256xf32> -> vector<8x256xf32>
    %19 = arith.truncf %18 : vector<8x256xf32> to vector<8x256xbf16>
    %c0_15 = arith.constant 0 : index
    %c0_16 = arith.constant 0 : index
    %20 = vector.load %arg8[%c0_15, %c0_16] : memref<1x256xbf16, #tpu.memory_space<vmem>>, vector<1x256xbf16>
    %21 = vector.broadcast %20 : vector<1x256xbf16> to vector<8x256xbf16>
    %22 = arith.addf %19, %21 : vector<8x256xbf16>
    %cst_17 = arith.constant 0.000000e+00 : bf16
    %23 = vector.broadcast %cst_17 : bf16 to vector<8x256xbf16>
    %24 = arith.maximumf %22, %23 : vector<8x256xbf16>
    %c0_18 = arith.constant 0 : index
    %c0_19 = arith.constant 0 : index
    %25 = vector.load %arg9[%c0_18, %c0_19] : memref<256x256xbf16, #tpu.memory_space<vmem>>, vector<256x256xbf16>
    %cst_20 = arith.constant dense<0.000000e+00> : vector<8x256xf32>
    %26 = tpu.matmul %24, %25, %cst_20 {dimension_numbers = #tpu.dot_dimension_numbers<[1], [0], [0], [1], [0, 0, 1, 1], [], []>} : vector<8x256xbf16>, vector<256x256xbf16>, vector<8x256xf32> -> vector<8x256xf32>
    %27 = arith.truncf %26 : vector<8x256xf32> to vector<8x256xbf16>
    %c0_21 = arith.constant 0 : index
    %c0_22 = arith.constant 0 : index
    %28 = vector.load %arg10[%c0_21, %c0_22] : memref<1x256xbf16, #tpu.memory_space<vmem>>, vector<1x256xbf16>
    %29 = vector.broadcast %28 : vector<1x256xbf16> to vector<8x256xbf16>
    %30 = arith.addf %27, %29 : vector<8x256xbf16>
    %cst_23 = arith.constant 0.000000e+00 : bf16
    %31 = vector.broadcast %cst_23 : bf16 to vector<8x256xbf16>
    %32 = arith.maximumf %30, %31 : vector<8x256xbf16>
    %c0_24 = arith.constant 0 : index
    %c0_25 = arith.constant 0 : index
    %33 = vector.load %arg11[%c0_24, %c0_25] : memref<256x256xbf16, #tpu.memory_space<vmem>>, vector<256x256xbf16>
    %cst_26 = arith.constant dense<0.000000e+00> : vector<8x256xf32>
    %34 = tpu.matmul %32, %33, %cst_26 {dimension_numbers = #tpu.dot_dimension_numbers<[1], [0], [0], [1], [0, 0, 1, 1], [], []>} : vector<8x256xbf16>, vector<256x256xbf16>, vector<8x256xf32> -> vector<8x256xf32>
    %35 = arith.truncf %34 : vector<8x256xf32> to vector<8x256xbf16>
    %c0_27 = arith.constant 0 : index
    %c0_28 = arith.constant 0 : index
    %36 = vector.load %arg12[%c0_27, %c0_28] : memref<1x256xbf16, #tpu.memory_space<vmem>>, vector<1x256xbf16>
    %37 = vector.broadcast %36 : vector<1x256xbf16> to vector<8x256xbf16>
    %38 = arith.addf %35, %37 : vector<8x256xbf16>
    %cst_29 = arith.constant 0.000000e+00 : bf16
    %39 = vector.broadcast %cst_29 : bf16 to vector<8x256xbf16>
    %40 = arith.maximumf %38, %39 : vector<8x256xbf16>
    %c0_30 = arith.constant 0 : index
    %c0_31 = arith.constant 0 : index
    %41 = vector.load %arg13[%c0_30, %c0_31] : memref<256x72xbf16, #tpu.memory_space<vmem>>, vector<256x72xbf16>
    %cst_32 = arith.constant dense<0.000000e+00> : vector<8x72xf32>
    %42 = tpu.matmul %40, %41, %cst_32 {dimension_numbers = #tpu.dot_dimension_numbers<[1], [0], [0], [1], [0, 0, 1, 1], [], []>} : vector<8x256xbf16>, vector<256x72xbf16>, vector<8x72xf32> -> vector<8x72xf32>
    %c0_33 = arith.constant 0 : index
    %c0_34 = arith.constant 0 : index
    %43 = vector.load %arg14[%c0_33, %c0_34] : memref<1x72xf32, #tpu.memory_space<vmem>>, vector<1x72xf32>
    %44 = vector.broadcast %43 : vector<1x72xf32> to vector<8x72xf32>
    %45 = arith.addf %42, %44 : vector<8x72xf32>
    %46 = vector.extract_strided_slice %45 {offsets = [0, 0], sizes = [8, 32], strides = [1, 1]} : vector<8x72xf32> to vector<8x32xf32>
    %cst_35 = arith.constant 0.000000e+00 : f32
    %47 = vector.broadcast %cst_35 : f32 to vector<8x32xf32>
    %48 = arith.maximumf %46, %47 : vector<8x32xf32>
    %49 = arith.truncf %48 : vector<8x32xf32> to vector<8x32xbf16>
    %c0_36 = arith.constant 0 : index
    %c0_37 = arith.constant 0 : index
    %50 = vector.load %arg2[%c0_36, %c0_37] : memref<8x40xbf16, #tpu.memory_space<vmem>>, vector<8x40xbf16>
    %51 = tpu.concatenate %49, %50 in 1 : vector<8x32xbf16>, vector<8x40xbf16> -> vector<8x72xbf16>
    %c0_38 = arith.constant 0 : index
    %c0_39 = arith.constant 0 : index
    %52 = vector.load %arg15[%c0_38, %c0_39] : memref<72x256xbf16, #tpu.memory_space<vmem>>, vector<72x256xbf16>
    %cst_40 = arith.constant dense<0.000000e+00> : vector<8x256xf32>
    %53 = tpu.matmul %51, %52, %cst_40 {dimension_numbers = #tpu.dot_dimension_numbers<[1], [0], [0], [1], [0, 0, 1, 1], [], []>} : vector<8x72xbf16>, vector<72x256xbf16>, vector<8x256xf32> -> vector<8x256xf32>
    %54 = arith.truncf %53 : vector<8x256xf32> to vector<8x256xbf16>
    %c0_41 = arith.constant 0 : index
    %c0_42 = arith.constant 0 : index
    %55 = vector.load %arg16[%c0_41, %c0_42] : memref<1x256xbf16, #tpu.memory_space<vmem>>, vector<1x256xbf16>
    %56 = vector.broadcast %55 : vector<1x256xbf16> to vector<8x256xbf16>
    %57 = arith.addf %54, %56 : vector<8x256xbf16>
    %cst_43 = arith.constant 0.000000e+00 : bf16
    %58 = vector.broadcast %cst_43 : bf16 to vector<8x256xbf16>
    %59 = arith.maximumf %57, %58 : vector<8x256xbf16>
    %c0_44 = arith.constant 0 : index
    %c0_45 = arith.constant 0 : index
    %60 = vector.load %arg17[%c0_44, %c0_45] : memref<256x40xbf16, #tpu.memory_space<vmem>>, vector<256x40xbf16>
    %cst_46 = arith.constant dense<0.000000e+00> : vector<8x40xf32>
    %61 = tpu.matmul %59, %60, %cst_46 {dimension_numbers = #tpu.dot_dimension_numbers<[1], [0], [0], [1], [0, 0, 1, 1], [], []>} : vector<8x256xbf16>, vector<256x40xbf16>, vector<8x40xf32> -> vector<8x40xf32>
    %c0_47 = arith.constant 0 : index
    %c0_48 = arith.constant 0 : index
    %62 = vector.load %arg18[%c0_47, %c0_48] : memref<1x40xf32, #tpu.memory_space<vmem>>, vector<1x40xf32>
    %63 = vector.broadcast %62 : vector<1x40xf32> to vector<8x40xf32>
    %64 = arith.addf %61, %63 : vector<8x40xf32>
    %cst_49 = arith.constant 0.000000e+00 : f32
    %65 = vector.broadcast %cst_49 : f32 to vector<8x56xf32>
    %cst_50 = arith.constant 0.000000e+00 : f32
    %66 = vector.broadcast %cst_50 : f32 to vector<8x88xf32>
    %67 = tpu.concatenate %45, %65, %64, %66 in 1 : vector<8x72xf32>, vector<8x56xf32>, vector<8x40xf32>, vector<8x88xf32> -> vector<8x256xf32>
    %c0_51 = arith.constant 0 : index
    %c0_52 = arith.constant 0 : index
    %68 = vector.load %arg19[%c0_51, %c0_52] : memref<8x256xf32, #tpu.memory_space<vmem>>, vector<8x256xf32>
    tpu.vector_store %arg19[%c0_51, %c0_52], %67 {strides = array<i32>} : memref<8x256xf32, #tpu.memory_space<vmem>>, vector<8x256xf32>,
    return
  }
  func.func @transform_0(%arg0: i32) -> (i32, i32) {
    %c0_i32 = arith.constant 0 : i32
    %c0_i32_0 = arith.constant 0 : i32
    return %arg0, %c0_i32 : i32, i32
  }
  func.func @transform_1(%arg0: i32) -> (i32, i32) {
    %c0_i32 = arith.constant 0 : i32
    %c0_i32_0 = arith.constant 0 : i32
    return %arg0, %c0_i32 : i32, i32
  }
  func.func @transform_2(%arg0: i32) -> (i32, i32) {
    %c0_i32 = arith.constant 0 : i32
    %c0_i32_0 = arith.constant 0 : i32
    %c0_i32_1 = arith.constant 0 : i32
    return %c0_i32, %c0_i32_0 : i32, i32
  }
  func.func @transform_3(%arg0: i32) -> (i32, i32) {
    %c0_i32 = arith.constant 0 : i32
    %c0_i32_0 = arith.constant 0 : i32
    %c0_i32_1 = arith.constant 0 : i32
    return %c0_i32, %c0_i32_0 : i32, i32
  }
  func.func @transform_4(%arg0: i32) -> (i32, i32) {
    %c0_i32 = arith.constant 0 : i32
    %c0_i32_0 = arith.constant 0 : i32
    %c0_i32_1 = arith.constant 0 : i32
    return %c0_i32, %c0_i32_0 : i32, i32
  }
  func.func @transform_5(%arg0: i32) -> (i32, i32) {
    %c0_i32 = arith.constant 0 : i32
    %c0_i32_0 = arith.constant 0 : i32
    %c0_i32_1 = arith.constant 0 : i32
    return %c0_i32, %c0_i32_0 : i32, i32
  }
  func.func @transform_6(%arg0: i32) -> (i32, i32) {
    %c0_i32 = arith.constant 0 : i32
    %c0_i32_0 = arith.constant 0 : i32
    %c0_i32_1 = arith.constant 0 : i32
    return %c0_i32, %c0_i32_0 : i32, i32
  }
  func.func @transform_7(%arg0: i32) -> (i32, i32) {
    %c0_i32 = arith.constant 0 : i32
    %c0_i32_0 = arith.constant 0 : i32
    %c0_i32_1 = arith.constant 0 : i32
    return %c0_i32, %c0_i32_0 : i32, i32
  }
  func.func @transform_8(%arg0: i32) -> (i32, i32) {
    %c0_i32 = arith.constant 0 : i32
    %c0_i32_0 = arith.constant 0 : i32
    %c0_i32_1 = arith.constant 0 : i32
    return %c0_i32, %c0_i32_0 : i32, i32
  }
  func.func @transform_9(%arg0: i32) -> (i32, i32) {
    %c0_i32 = arith.constant 0 : i32
    %c0_i32_0 = arith.constant 0 : i32
    %c0_i32_1 = arith.constant 0 : i32
    return %c0_i32, %c0_i32_0 : i32, i32
  }
  func.func @transform_10(%arg0: i32) -> (i32, i32) {
    %c0_i32 = arith.constant 0 : i32
    %c0_i32_0 = arith.constant 0 : i32
    %c0_i32_1 = arith.constant 0 : i32
    return %c0_i32, %c0_i32_0 : i32, i32
  }
  func.func @transform_11(%arg0: i32) -> (i32, i32) {
    %c0_i32 = arith.constant 0 : i32
    %c0_i32_0 = arith.constant 0 : i32
    %c0_i32_1 = arith.constant 0 : i32
    return %c0_i32, %c0_i32_0 : i32, i32
  }
  func.func @transform_12(%arg0: i32) -> (i32, i32) {
    %c0_i32 = arith.constant 0 : i32
    %c0_i32_0 = arith.constant 0 : i32
    %c0_i32_1 = arith.constant 0 : i32
    return %c0_i32, %c0_i32_0 : i32, i32
  }
  func.func @transform_13(%arg0: i32) -> (i32, i32) {
    %c0_i32 = arith.constant 0 : i32
    %c0_i32_0 = arith.constant 0 : i32
    %c0_i32_1 = arith.constant 0 : i32
    return %c0_i32, %c0_i32_0 : i32, i32
  }
  func.func @transform_14(%arg0: i32) -> (i32, i32) {
    %c0_i32 = arith.constant 0 : i32
    %c0_i32_0 = arith.constant 0 : i32
    %c0_i32_1 = arith.constant 0 : i32
    return %c0_i32, %c0_i32_0 : i32, i32
  }
  func.func @transform_15(%arg0: i32) -> (i32, i32) {
    %c0_i32 = arith.constant 0 : i32
    %c0_i32_0 = arith.constant 0 : i32
    %c0_i32_1 = arith.constant 0 : i32
    return %c0_i32, %c0_i32_0 : i32, i32
  }
  func.func @transform_16(%arg0: i32) -> (i32, i32) {
    %c0_i32 = arith.constant 0 : i32
    %c0_i32_0 = arith.constant 0 : i32
    %c0_i32_1 = arith.constant 0 : i32
    return %c0_i32, %c0_i32_0 : i32, i32
  }
  func.func @transform_17(%arg0: i32) -> (i32, i32) {
    %c0_i32 = arith.constant 0 : i32
    %c0_i32_0 = arith.constant 0 : i32
    %c0_i32_1 = arith.constant 0 : i32
    return %c0_i32, %c0_i32_0 : i32, i32
  }
  func.func @transform_18(%arg0: i32) -> (i32, i32) {
    %c0_i32 = arith.constant 0 : i32
    %c0_i32_0 = arith.constant 0 : i32
    return %arg0, %c0_i32 : i32, i32
  }
}

</mosaic_0001>

<bundles_post_ra>
// kernel: tpu_custom_call.1
= control target key start
LH: loop header
LB: loop body
LE: loop exit
PB: predicated region body
PF: predicated region fallthrough
CT: control target
= control target key end

     0   :  { %s3455_s0 = inlined_call_operand.vmem [shape: bf16[8,16], index: 0, kind: input, shape index: {}]   ;;  %s3456_s1 = inlined_call_operand.hbm [shape: bf16[8,40], index: 1, kind: input, shape index: {}]   ;;  %s3457_s2 = inlined_call_operand.hbm [shape: bf16[16,256], index: 2, kind: input, shape index: {}]   ;;  %s3458_s3 = inlined_call_operand.hbm [shape: bf16[1,256], index: 3, kind: input, shape index: {}]   ;;  %s3459_s4 = inlined_call_operand.vmem [shape: bf16[256,256], index: 4, kind: input, shape index: {}]   ;;  %s3460_s5 = inlined_call_operand.hbm [shape: bf16[1,256], index: 5, kind: input, shape index: {}]   ;;  %s3461_s6 = inlined_call_operand.hbm [shape: bf16[256,256], index: 6, kind: input, shape index: {}]   ;;  %s3462_s7 = inlined_call_operand.hbm [shape: bf16[1,256], index: 7, kind: input, shape index: {}]   ;;  %s3463_s8 = inlined_call_operand.hbm [shape: bf16[256,256], index: 8, kind: input, shape index: {}]   ;;  %s3464_s9 = inlined_call_operand.vmem [shape: bf16[1,256], index: 9, kind: input, shape index: {}]   ;;  %s3465_s10 = inlined_call_operand.hbm [shape: bf16[256,256], index: 10, kind: input, shape index: {}]   ;;  %s3466_s11 = inlined_call_operand.hbm [shape: bf16[1,256], index: 11, kind: input, shape index: {}]   ;;  %s3467_s12 = inlined_call_operand.vmem [shape: bf16[256,72], index: 12, kind: input, shape index: {}]   ;;  %s3468_s13 = inlined_call_operand.vmem [shape: f32[1,72], index: 13, kind: input, shape index: {}]   ;;  %s3469_s14 = inlined_call_operand.vmem [shape: bf16[72,256], index: 14, kind: input, shape index: {}]   ;;  %s3470_s15 = inlined_call_operand.vmem [shape: bf16[1,256], index: 15, kind: input, shape index: {}]   ;;  %s3471_s16 = inlined_call_operand.vmem [shape: bf16[256,40], index: 16, kind: input, shape index: {}]   ;;  %s3472_s17 = inlined_call_operand.vmem [shape: f32[1,40], index: 17, kind: input, shape index: {}]   ;;  %s3473_s18 = inlined_call_operand.hbm [shape: f32[8,256], index: 18, kind: output, shape index: {}]  }
   0x1   :  { %3478 = sst [smem:[#allocation24_spill]] %s3455_s0 }
   0x2   :  { %3479 = sst [smem:[#allocation25_spill]] %s3456_s1 }
   0x3   :  { %3480 = sst [smem:[#allocation26_spill]] %s3457_s2 }
   0x4   :  { %23 = vsyncpa [#allocation3], 0 }
   0x5   :  { %24 = vsyncpa [#allocation6], 0 }
   0x6   :  { %25 = vsyncpa [#allocation9], 0 }
   0x7   :  { %26 = vsyncpa [#allocation12], 0 }
   0x8   :  { %27 = vsyncpa [#allocation15], 0  ;;  %s3481_s29 = sld [smem:[#allocation26_spill]] }
   0xe   :  { %s46_s30 = sshll.u32 %s3481_s29, 4  ;;  %s47_s30 = int_to_ptr.hbm [resolvable:$true] %s46_s30 }
   0xf   :  { %28 = vsyncpa [#allocation4], 0  ;;  %s2925_s0 = smov [#allocation5]   ;;  %s73_s21 = sshll.u32 %s3460_s5, 4  ;;  %s74_s21 = int_to_ptr.hbm [resolvable:$true] %s73_s21 }
  0x10   :  { %s48_s19 = sshll.u32 %s2925_s0, 4  ;;  %s3474_s22 = smov 128   ;;  %s49_s19 = int_to_ptr.vmem [resolvable:$true] %s48_s19 }
  0x11   :  { %s3476_s2 = smov 8   ;;  %s2928_s23 = smov [#allocation8]  }
  0x12   :  { %54 = dma.hbm_to_vmem [thread:$0]  %s47_s30, 256, %s49_s19, [#allocation6], %s3474_s22, %s3474_s22, %s3476_s2  }
  0x13   :  { %s75_s24 = sshll.u32 %s2928_s23, 4  ;;  %s97_s27 = sshll.u32 %s3462_s7, 4  ;;  %s76_s24 = int_to_ptr.vmem [resolvable:$true] %s75_s24  ;;  %s98_s27 = int_to_ptr.hbm [resolvable:$true] %s97_s27 }
  0x14   :  { %78 = dma.hbm_to_vmem [thread:$0]  %s74_s21, 32, %s76_s24, [#allocation9]  }
  0x15   :  { %s122_s5 = sshll.u32 %s3465_s10, 4  ;;  %s2929_s0 = smov [#allocation11]   ;;  %s123_s5 = int_to_ptr.hbm [resolvable:$true] %s122_s5 }
  0x16   :  { %s99_s1 = sshll.u32 %s2929_s0, 4  ;;  %s2930_s30 = smov [#allocation14]   ;;  %s100_s1 = int_to_ptr.vmem [resolvable:$true] %s99_s1 }
  0x17   :  { %102 = dma.hbm_to_vmem [thread:$0]  %s98_s27, 32, %s100_s1, [#allocation12]  }
  0x18   :  { %s124_s19 = sshll.u32 %s2930_s30, 4  ;;  %s3482_s22 = sld [smem:[#allocation25_spill]]  ;;  %s125_s19 = int_to_ptr.vmem [resolvable:$true] %s124_s19 }
  0x19   :  { %s3483_s7 = smov 8   ;;  %s3484_s25 = smov 128  }
  0x1a   :  { %130 = dma.hbm_to_vmem [thread:$0]  %s123_s5, 4096, %s125_s19, [#allocation15], %s3484_s25, %s3484_s25, %s3483_s7  }
  0x1b   :  { %s60_s10 = sshll.u32 %s3458_s3, 4  ;;  %s2931_s26 = smov [#allocation2]   ;;  %s61_s10 = int_to_ptr.hbm [resolvable:$true] %s60_s10 }
  0x1c   :  { %s38_s28 = sshll.u32 %s2931_s26, 4  ;;  %s2932_s27 = smov [#allocation7]   ;;  %s39_s28 = int_to_ptr.vmem [resolvable:$true] %s38_s28 }
  0x1d   :  { %s62_s29 = sshll.u32 %s2932_s27, 4  ;;  %s107_s19 = sshll.u32 %s3463_s8, 4  ;;  %s63_s29 = int_to_ptr.vmem [resolvable:$true] %s62_s29  ;;  %s108_s19 = int_to_ptr.hbm [resolvable:$true] %s107_s19 }
  0x1e   :  { %s36_s2 = sshll.u32 %s3482_s22, 4  ;;  %s83_s22 = sshll.u32 %s3461_s6, 4  ;;  %s37_s2 = int_to_ptr.hbm [resolvable:$true] %s36_s2  ;;  %s84_s22 = int_to_ptr.hbm [resolvable:$true] %s83_s22 }
  0x1f   :  { %41 = dma.hbm_to_vmem [thread:$0]  %s37_s2, 64, %s39_s28, [#allocation3]  }
  0x20   :  { %65 = dma.hbm_to_vmem [thread:$0]  %s61_s10, 32, %s63_s29, [#allocation6]  }
  0x21   :  { %s2933_s20 = smov [#allocation10]   ;;  %s2934_s2 = smov [#allocation13]  }
  0x22   :  { %s85_s3 = sshll.u32 %s2933_s20, 4  ;;  %s109_s23 = sshll.u32 %s2934_s2, 4  ;;  %s86_s3 = int_to_ptr.vmem [resolvable:$true] %s85_s3  ;;  %s110_s23 = int_to_ptr.vmem [resolvable:$true] %s109_s23 }
  0x23   :  { %91 = dma.hbm_to_vmem [thread:$0]  %s84_s22, 4096, %s86_s3, [#allocation9], %s3484_s25, %s3484_s25, %s3483_s7  }
  0x24   :  { %s136_s6 = sshll.u32 %s3466_s11, 4  ;;  %s2935_s8 = smov [#allocation16]   ;;  %s137_s6 = int_to_ptr.hbm [resolvable:$true] %s136_s6 }
  0x25   :  { %115 = dma.hbm_to_vmem [thread:$0]  %s108_s19, 4096, %s110_s23, [#allocation12], %s3484_s25, %s3484_s25, %s3483_s7  }
  0x26   :  { %s138_s10 = sshll.u32 %s2935_s8, 4  ;;  %s139_s10 = int_to_ptr.vmem [resolvable:$true] %s138_s10 }
  0x27   :  { %141 = dma.hbm_to_vmem [thread:$0]  %s137_s6, 32, %s139_s10, [#allocation15]  }
  0x28   :  { %2913 = dma.done.wait [#allocation3], 64  }
  0x29   :  { %2914 = vsyncadd [#allocation3], 4294967232 }
  0x2a   :  { %2915 = dma.done.wait [#allocation6], 288  }
  0x2b   :  { %2916 = vsyncadd [#allocation6], 4294967008 }
  0x2c   :  { %2917 = dma.done.wait [#allocation9], 4128  }
  0x2d   :  { %2918 = vsyncadd [#allocation9], 4294963168 }
  0x2e   :  { %2919 = dma.done.wait [#allocation12], 4128  }
  0x2f   :  { %2920 = vsyncadd [#allocation12], 4294963168 }
  0x30   :  { %2921 = dma.done.wait [#allocation15], 4128  }
  0x31   :  { %2922 = vsyncadd [#allocation15], 4294963168  ;;  %vm204_vm0 = vcmask 130048   ;;  %v1806_v0 = vld [vmem:[#allocation5] sm:$0xf]  ;;  %s3485_s25 = sld [smem:[#allocation24_spill]] }
  0x32   :  { %v2489_v1 = vld [vmem:[#allocation5 + $0x4] sm:$0xf0]  ;;  %v2488_v2 = vld [vmem:[#allocation5 + $0x4] sm:$0xf]  ;;  %v1808_v4 = vld [vmem:[#allocation5 + $0x8] sm:$0xf0] }
  0x33   :  { %v1807_v3 = vor.u32 %v2489_v1, %v1806_v0  ;;  %v1872_v6 = vld [vmem:[%s3459_s4 + $0x70] sm:$0xf]  ;;  %v1811_v7 = vor.u32 %v2488_v2, %v1808_v4  ;;  %v2505_v8 = vld [vmem:[%s3459_s4 + $0x74] sm:$0xf0]  ;;  %v2504_v13 = vld [vmem:[%s3459_s4 + $0x74] sm:$0xf] }
  0x34   :  { %v1936_v9 = vld [vmem:[%s3459_s4 + $0xf0] sm:$0xf]  ;;  %v2521_v10 = vld [vmem:[%s3459_s4 + $0xf4] sm:$0xf0]  ;;  %v1873_v11 = vor.u32 %v2505_v8, %v1872_v6  ;;  %v1874_v14 = vld [vmem:[%s3459_s4 + $0x78] sm:$0xf0] }
  0x35   :  { %215 = vmatpush.bf16.msra.mxu2 %v1807_v3  ;;  %v1937_v12 = vor.u32 %v2521_v10, %v1936_v9  ;;  %v2520_v15 = vld [vmem:[%s3459_s4 + $0xf4] sm:$0xf]  ;;  %228 = vmatpush.bf16.msra.mxu3 %v1811_v7  ;;  %v1877_v16 = vor.u32 %v2504_v13, %v1874_v14  ;;  %v1938_v17 = vld [vmem:[%s3459_s4 + $0xf8] sm:$0xf0]  ;;  %v1864_v18 = vld [vmem:[%s3459_s4 + $0x60] sm:$0xf] }
  0x36   :  { %v2503_v19 = vld [vmem:[%s3459_s4 + $0x64] sm:$0xf0]  ;;  %v1941_v20 = vor.u32 %v2520_v15, %v1938_v17  ;;  %v1928_v22 = vld [vmem:[%s3459_s4 + $0xe0] sm:$0xf]  ;;  %v2502_v24 = vld [vmem:[%s3459_s4 + $0x64] sm:$0xf] }
  0x37   :  { %v191_v5 = vld [vmem:[%s3485_s25] sm:$0xf]  ;;  %v1865_v21 = vor.u32 %v2503_v19, %v1864_v18  ;;  %v2519_v23 = vld [vmem:[%s3459_s4 + $0xe4] sm:$0xf0]  ;;  %477 = vmatpush.bf16.msra.mxu0 %v1877_v16  ;;  %v1866_v26 = vld [vmem:[%s3459_s4 + $0x68] sm:$0xf0] }
  0x38   :  { %1812 = vmatmul.msk.bf16.vlgmr.msra.gmra.mxu2 %vm204_vm0, %v191_v5  ;;  %v1929_v25 = vor.u32 %v2519_v23, %v1928_v22  ;;  %v2518_v27 = vld [vmem:[%s3459_s4 + $0xe4] sm:$0xf]  ;;  %v1930_v28 = vld [vmem:[%s3459_s4 + $0xe8] sm:$0xf0]  ;;  %1813 = vmatmul.msk.bf16.vlgmr.msra.gmra.mxu3 %vm204_vm0, %v191_v5  ;;  %v1869_v29 = vor.u32 %v2502_v24, %v1866_v26  ;;  %v1856_v31 = vld [vmem:[%s3459_s4 + $0x50] sm:$0xf] }
  0x39   :  { %451 = vmatpush.bf16.msrb.mxu2 %v1873_v11  ;;  %464 = vmatpush.bf16.msrb.mxu3 %v1937_v12  ;;  %v1933_v30 = vor.u32 %v2518_v27, %v1930_v28  ;;  %v2501_v32 = vld [vmem:[%s3459_s4 + $0x54] sm:$0xf0]  ;;  %v1920_v33 = vld [vmem:[%s3459_s4 + $0xd0] sm:$0xf]  ;;  %v2500_v35 = vld [vmem:[%s3459_s4 + $0x54] sm:$0xf] }
  0x3a   :  { %490 = vmatpush.bf16.msra.mxu1 %v1941_v20  ;;  %v2517_v34 = vld [vmem:[%s3459_s4 + $0xd4] sm:$0xf0]  ;;  %v1858_v36 = vld [vmem:[%s3459_s4 + $0x58] sm:$0xf0]  ;;  %v1857_v37 = vor.u32 %v2501_v32, %v1856_v31  ;;  %v2516_v39 = vld [vmem:[%s3459_s4 + $0xd4] sm:$0xf] }
  0x3b   :  { %v1921_v38 = vor.u32 %v2517_v34, %v1920_v33  ;;  %v1922_v40 = vld [vmem:[%s3459_s4 + $0xd8] sm:$0xf0]  ;;  %v1848_v41 = vld [vmem:[%s3459_s4 + $0x40] sm:$0xf]  ;;  %478 = vmatpush.bf16.msra.mxu0 %v1869_v29  ;;  %v1861_v42 = vor.u32 %v2500_v35, %v1858_v36  ;;  %v2499_v43 = vld [vmem:[%s3459_s4 + $0x44] sm:$0xf0] }
  0x3c   :  { %v1912_v44 = vld [vmem:[%s3459_s4 + $0xc0] sm:$0xf]  ;;  %v2515_v45 = vld [vmem:[%s3459_s4 + $0xc4] sm:$0xf0]  ;;  %v1925_v46 = vor.u32 %v2516_v39, %v1922_v40  ;;  %v2498_v47 = vld [vmem:[%s3459_s4 + $0x44] sm:$0xf]  ;;  %v1849_v51 = vor.u32 %v2499_v43, %v1848_v41 }
  0x3d   :  { %452 = vmatpush.bf16.msrb.mxu2 %v1865_v21  ;;  %465 = vmatpush.bf16.msrb.mxu3 %v1929_v25  ;;  %v1850_v48 = vld [vmem:[%s3459_s4 + $0x48] sm:$0xf0]  ;;  %v2514_v49 = vld [vmem:[%s3459_s4 + $0xc4] sm:$0xf]  ;;  %v1913_v52 = vor.u32 %v2515_v45, %v1912_v44  ;;  %v1840_v53 = vld [vmem:[%s3459_s4 + $0x30] sm:$0xf] }
  0x3e   :  { %491 = vmatpush.bf16.msra.mxu1 %v1933_v30  ;;  %v1914_v50 = vld [vmem:[%s3459_s4 + $0xc8] sm:$0xf0]  ;;  %v2497_v54 = vld [vmem:[%s3459_s4 + $0x34] sm:$0xf0]  ;;  %v1853_v55 = vor.u32 %v2498_v47, %v1850_v48  ;;  %v1904_v56 = vld [vmem:[%s3459_s4 + $0xb0] sm:$0xf] }
  0x3f   :  { %479 = vmatpush.bf16.msra.mxu0 %v1861_v42  ;;  %v2513_v57 = vld [vmem:[%s3459_s4 + $0xb4] sm:$0xf0]  ;;  %v2496_v58 = vld [vmem:[%s3459_s4 + $0x34] sm:$0xf]  ;;  %v1917_v59 = vor.u32 %v2514_v49, %v1914_v50  ;;  %v1842_v60 = vld [vmem:[%s3459_s4 + $0x38] sm:$0xf0]  ;;  %v1841_v63 = vor.u32 %v2497_v54, %v1840_v53 }
  0x40   :  { %v2512_v61 = vld [vmem:[%s3459_s4 + $0xb4] sm:$0xf]  ;;  %v1906_v62 = vld [vmem:[%s3459_s4 + $0xb8] sm:$0xf0]  ;;  %v1905_v0 = vor.u32 %v2513_v57, %v1904_v56  ;;  %v1845_v1 = vor.u32 %v2496_v58, %v1842_v60  ;;  %v1832_v4 = vld [vmem:[%s3459_s4 + $0x20] sm:$0xf] }
  0x41   :  { %453 = vmatpush.bf16.msrb.mxu2 %v1857_v37  ;;  %466 = vmatpush.bf16.msrb.mxu3 %v1921_v38  ;;  %v1909_v2 = vor.u32 %v2512_v61, %v1906_v62  ;;  %v235_v3 = vld [vmem:[#allocation7] sm:$0x3]  ;;  %v2495_v5 = vld [vmem:[%s3459_s4 + $0x24] sm:$0xf0]  ;;  %v1896_v6 = vld [vmem:[%s3459_s4 + $0xa0] sm:$0xf] }
  0x42   :  { %492 = vmatpush.bf16.msra.mxu1 %v1925_v46  ;;  %237 = vst [vmem:[#allocation1] ss:$9 sm:$0xff] %v235_v3  ;;  %v1833_v7 = vor.u32 %v2495_v5, %v1832_v4  ;;  %v2511_v8 = vld [vmem:[%s3459_s4 + $0xa4] sm:$0xf0]  ;;  %v2494_v10 = vld [vmem:[%s3459_s4 + $0x24] sm:$0xf] }
  0x43   :  { %480 = vmatpush.bf16.msra.mxu0 %v1853_v55  ;;  %v1897_v9 = vor.u32 %v2511_v8, %v1896_v6  ;;  %v1834_v11 = vld [vmem:[%s3459_s4 + $0x28] sm:$0xf0]  ;;  %v2510_v12 = vld [vmem:[%s3459_s4 + $0xa4] sm:$0xf]  ;;  %v1824_v16 = vld [vmem:[%s3459_s4 + $0x10] sm:$0xf] }
  0x44   :  { %v1837_v13 = vor.u32 %v2494_v10, %v1834_v11  ;;  %v1898_v14 = vld [vmem:[%s3459_s4 + $0xa8] sm:$0xf0]  ;;  %v2493_v17 = vld [vmem:[%s3459_s4 + $0x14] sm:$0xf0]  ;;  %v1888_v19 = vld [vmem:[%s3459_s4 + $0x90] sm:$0xf] }
  0x45   :  { %454 = vmatpush.bf16.msrb.mxu2 %v1849_v51  ;;  %467 = vmatpush.bf16.msrb.mxu3 %v1913_v52  ;;  %v1901_v15 = vor.u32 %v2510_v12, %v1898_v14  ;;  %v1825_v18 = vor.u32 %v2493_v17, %v1824_v16  ;;  %v2509_v20 = vld [vmem:[%s3459_s4 + $0x94] sm:$0xf0]  ;;  %v2492_v21 = vld [vmem:[%s3459_s4 + $0x14] sm:$0xf]  ;;  %v1826_v23 = vld [vmem:[%s3459_s4 + $0x18] sm:$0xf0] }
  0x46   :  { %493 = vmatpush.bf16.msra.mxu1 %v1917_v59  ;;  %v1889_v22 = vor.u32 %v2509_v20, %v1888_v19  ;;  %v2508_v24 = vld [vmem:[%s3459_s4 + $0x94] sm:$0xf]  ;;  %v1890_v25 = vld [vmem:[%s3459_s4 + $0x98] sm:$0xf0]  ;;  %v1829_v28 = vor.u32 %v2492_v21, %v1826_v23  ;;  %v1816_v31 = vld [vmem:[%s3459_s4] sm:$0xf] }
  0x47   :  { %481 = vmatpush.bf16.msra.mxu0 %v1845_v1  ;;  %v1893_v29 = vor.u32 %v2508_v24, %v1890_v25  ;;  %v504_v30 = vld [vmem:[#allocation8] sm:$0x3]  ;;  %v2491_v32 = vld [vmem:[%s3459_s4 + $0x4] sm:$0xf0]  ;;  %v1880_v34 = vld [vmem:[%s3459_s4 + $0x80] sm:$0xf] }
  0x48   :  { %v1817_v33 = vor.u32 %v2491_v32, %v1816_v31  ;;  %v2507_v35 = vld [vmem:[%s3459_s4 + $0x84] sm:$0xf0]  ;;  %v2490_v37 = vld [vmem:[%s3459_s4 + $0x4] sm:$0xf]  ;;  %v1818_v38 = vld [vmem:[%s3459_s4 + $0x8] sm:$0xf0] }
  0x49   :  { %455 = vmatpush.bf16.msrb.mxu2 %v1841_v63  ;;  %468 = vmatpush.bf16.msrb.mxu3 %v1905_v0  ;;  %v3245_v26 = vld [vmem:[#allocation1] sm:$0xff]  ;;  %v3247_v27 = vld [vmem:[#allocation1 + $0x9] sm:$0xff]  ;;  %v1881_v36 = vor.u32 %v2507_v35, %v1880_v34  ;;  %v1821_v40 = vor.u32 %v2490_v37, %v1818_v38  ;;  %v2537_v44 = vld [vmem:[#allocation10 + $0x74] sm:$0xf0]  ;;  %vm1562_vm1 = vcmask 1043456   ;;  %s2936_s23 = smov 32  }
  0x4a   :  { %494 = vmatpush.bf16.msra.mxu1 %v1909_v2  ;;  %506 = vst [vmem:[#allocation1] ss:$9 sm:$0xff] %v504_v30  ;;  %v2506_v39 = vld [vmem:[%s3459_s4 + $0x84] sm:$0xf]  ;;  %v1882_v41 = vld [vmem:[%s3459_s4 + $0x88] sm:$0xf0]  ;;  %v243_v16 = vpack.i.b16 %v3247_v27, %v3247_v27 }
  0x4b   :  { %482 = vmatpush.bf16.msra.mxu0 %v1837_v13  ;;  %v1885_v42 = vor.u32 %v2506_v39, %v1882_v41  ;;  %v2000_v43 = vld [vmem:[#allocation10 + $0x70] sm:$0xf]  ;;  %v2553_v47 = vld [vmem:[#allocation10 + $0xf4] sm:$0xf0]  ;;  %v2536_v48 = vld [vmem:[#allocation10 + $0x74] sm:$0xf] }
  0x4c   :  { %v2064_v45 = vld [vmem:[#allocation10 + $0xf0] sm:$0xf]  ;;  %v2001_v46 = vor.u32 %v2537_v44, %v2000_v43  ;;  %v2002_v49 = vld [vmem:[#allocation10 + $0x78] sm:$0xf0]  ;;  %v2552_v52 = vld [vmem:[#allocation10 + $0xf4] sm:$0xf] }
  0x4d   :  { %456 = vmatpush.bf16.msrb.mxu2 %v1833_v7  ;;  %469 = vmatpush.bf16.msrb.mxu3 %v1897_v9  ;;  %v2065_v50 = vor.u32 %v2553_v47, %v2064_v45  ;;  %v2005_v51 = vor.u32 %v2536_v48, %v2002_v49  ;;  %v2066_v53 = vld [vmem:[#allocation10 + $0xf8] sm:$0xf0]  ;;  %v1992_v54 = vld [vmem:[#allocation10 + $0x60] sm:$0xf]  ;;  %v2535_v56 = vld [vmem:[#allocation10 + $0x64] sm:$0xf0] }
  0x4e   :  { %495 = vmatpush.bf16.msra.mxu1 %v1901_v15  ;;  %v2069_v55 = vor.u32 %v2552_v52, %v2066_v53  ;;  %v2056_v57 = vld [vmem:[#allocation10 + $0xe0] sm:$0xf]  ;;  %v2551_v58 = vld [vmem:[#allocation10 + $0xe4] sm:$0xf0]  ;;  %v1993_v59 = vor.u32 %v2535_v56, %v1992_v54  ;;  %v2534_v61 = vld [vmem:[#allocation10 + $0x64] sm:$0xf]  ;;  %v240_v15 = vpack.i.b16 %v3245_v26, %v3245_v26 }
  0x4f   :  { %483 = vmatpush.bf16.msra.mxu0 %v1829_v28  ;;  %v2057_v60 = vor.u32 %v2551_v58, %v2056_v57  ;;  %v1994_v62 = vld [vmem:[#allocation10 + $0x68] sm:$0xf0]  ;;  %v2550_v63 = vld [vmem:[#allocation10 + $0xe4] sm:$0xf]  ;;  %v1984_v2 = vld [vmem:[#allocation10 + $0x50] sm:$0xf] }
  0x50   :  { %v1997_v0 = vor.u32 %v2534_v61, %v1994_v62  ;;  %v2058_v1 = vld [vmem:[#allocation10 + $0xe8] sm:$0xf0]  ;;  %v2533_v3 = vld [vmem:[#allocation10 + $0x54] sm:$0xf0]  ;;  %v2048_v5 = vld [vmem:[#allocation10 + $0xd0] sm:$0xf] }
  0x51   :  { %457 = vmatpush.bf16.msrb.mxu2 %v1825_v18  ;;  %470 = vmatpush.bf16.msrb.mxu3 %v1889_v22  ;;  %v2061_v4 = vor.u32 %v2550_v63, %v2058_v1  ;;  %v2549_v6 = vld [vmem:[#allocation10 + $0xd4] sm:$0xf0]  ;;  %v2532_v7 = vld [vmem:[#allocation10 + $0x54] sm:$0xf]  ;;  %v1985_v8 = vor.u32 %v2533_v3, %v1984_v2  ;;  %v1986_v9 = vld [vmem:[#allocation10 + $0x58] sm:$0xf0] }
  0x52   :  { %496 = vmatpush.bf16.msra.mxu1 %v1893_v29  ;;  %v2548_v10 = vld [vmem:[#allocation10 + $0xd4] sm:$0xf]  ;;  %v2050_v11 = vld [vmem:[#allocation10 + $0xd8] sm:$0xf0]  ;;  %v2049_v12 = vor.u32 %v2549_v6, %v2048_v5  ;;  %v1989_v13 = vor.u32 %v2532_v7, %v1986_v9  ;;  %v242_v17 = vperm.slane %v240_v15, 0  ;;  %v245_v18 = vperm.slane %v243_v16, 0 }
  0x53   :  { %484 = vmatpush.bf16.msra.mxu0 %v1821_v40  ;;  %v2053_v14 = vor.u32 %v2548_v10, %v2050_v11  ;;  %v1976_v27 = vld [vmem:[#allocation10 + $0x40] sm:$0xf]  ;;  %v2531_v35 = vld [vmem:[#allocation10 + $0x44] sm:$0xf0]  ;;  %v2530_v39 = vld [vmem:[#allocation10 + $0x44] sm:$0xf] }
  0x54   :  { %v248_v22 = vunpack.c.l.bf16 %v242_v17  ;;  %v249_v23 = vunpack.c.l.bf16 %v245_v18  ;;  %v1977_v37 = vor.u32 %v2531_v35, %v1976_v27  ;;  %v2547_v38 = vld [vmem:[#allocation10 + $0xc4] sm:$0xf0]  ;;  %v1978_v40 = vld [vmem:[#allocation10 + $0x48] sm:$0xf0]  ;;  %v2546_v43 = vld [vmem:[#allocation10 + $0xc4] sm:$0xf] }
  0x55   :  { %458 = vmatpush.bf16.msrb.mxu2 %v1817_v33  ;;  %471 = vmatpush.bf16.msrb.mxu3 %v1881_v36  ;;  %v2040_v36 = vld [vmem:[#allocation10 + $0xc0] sm:$0xf]  ;;  %v2042_v44 = vld [vmem:[#allocation10 + $0xc8] sm:$0xf0]  ;;  %v2529_v47 = vld [vmem:[#allocation10 + $0x34] sm:$0xf0] }
  0x56   :  { %497 = vmatpush.bf16.msra.mxu1 %v1885_v42  ;;  %v2041_v41 = vor.u32 %v2547_v38, %v2040_v36  ;;  %v1981_v42 = vor.u32 %v2530_v39, %v1978_v40  ;;  %v2045_v45 = vor.u32 %v2546_v43, %v2042_v44  ;;  %v2032_v48 = vld [vmem:[#allocation10 + $0xb0] sm:$0xf]  ;;  %v1970_v52 = vld [vmem:[#allocation10 + $0x38] sm:$0xf0]  ;;  %v1960_v58 = vld [vmem:[#allocation10 + $0x20] sm:$0xf] }
  0x57   :  { %746 = vmatpush.bf16.msrb.mxu0 %v2005_v51  ;;  %v2528_v51 = vld [vmem:[#allocation10 + $0x34] sm:$0xf]  ;;  %v2034_v56 = vld [vmem:[#allocation10 + $0xb8] sm:$0xf0]  ;;  %v2543_v62 = vld [vmem:[#allocation10 + $0xa4] sm:$0xf0] }
  0x58   :  { %v1973_v54 = vor.u32 %v2528_v51, %v1970_v52  ;;  %v1962_v1 = vld [vmem:[#allocation10 + $0x28] sm:$0xf0]  ;;  %v2542_v2 = vld [vmem:[#allocation10 + $0xa4] sm:$0xf]  ;;  %v1952_v6 = vld [vmem:[#allocation10 + $0x10] sm:$0xf] }
  0x59   :  { %720 = vmatpush.bf16.msra.mxu2 %v2001_v46  ;;  %733 = vmatpush.bf16.msra.mxu3 %v2065_v50  ;;  %v1968_v46 = vld [vmem:[#allocation10 + $0x30] sm:$0xf]  ;;  %v2545_v50 = vld [vmem:[#allocation10 + $0xb4] sm:$0xf0]  ;;  %v2524_v11 = vld [vmem:[#allocation10 + $0x14] sm:$0xf] }
  0x5a   :  { %759 = vmatpush.bf16.msrb.mxu1 %v2069_v55  ;;  %v1969_v49 = vor.u32 %v2529_v47, %v1968_v46  ;;  %v2033_v53 = vor.u32 %v2545_v50, %v2032_v48  ;;  %v2544_v55 = vld [vmem:[#allocation10 + $0xb4] sm:$0xf]  ;;  %v2525_v7 = vld [vmem:[#allocation10 + $0x14] sm:$0xf0]  ;;  %v2016_v9 = vld [vmem:[#allocation10 + $0x90] sm:$0xf] }
  0x5b   :  { %747 = vmatpush.bf16.msrb.mxu0 %v1997_v0  ;;  %v2037_v57 = vor.u32 %v2544_v55, %v2034_v56  ;;  %v2526_v0 = vld [vmem:[#allocation10 + $0x24] sm:$0xf]  ;;  %v2541_v10 = vld [vmem:[#allocation10 + $0x94] sm:$0xf0]  ;;  %v2018_v15 = vld [vmem:[#allocation10 + $0x98] sm:$0xf0] }
  0x5c   :  { %v1965_v3 = vor.u32 %v2526_v0, %v1962_v1  ;;  %v3277_v16 = vld [vmem:[#allocation1] sm:$0xff]  ;;  %v3279_v17 = vld [vmem:[#allocation1 + $0x9] sm:$0xff]  ;;  %v2569_v27 = vld [vmem:[#allocation13 + $0x74] sm:$0xf0]  ;;  %vm1559_vm2 = vcmask 588800   ;;  %vm1501_vm3 = vcmask 261120  }
  0x5d   :  { %721 = vmatpush.bf16.msra.mxu2 %v1993_v59  ;;  %734 = vmatpush.bf16.msra.mxu3 %v2057_v60  ;;  %v2527_v59 = vld [vmem:[#allocation10 + $0x24] sm:$0xf0]  ;;  %v2024_v60 = vld [vmem:[#allocation10 + $0xa0] sm:$0xf]  ;;  %v2192_v35 = vld [vmem:[#allocation13 + $0xf0] sm:$0xf] }
  0x5e   :  { %760 = vmatpush.bf16.msrb.mxu1 %v2061_v4  ;;  %v1961_v61 = vor.u32 %v2527_v59, %v1960_v58  ;;  %v2025_v63 = vor.u32 %v2543_v62, %v2024_v60  ;;  %v2026_v4 = vld [vmem:[#allocation10 + $0xa8] sm:$0xf0]  ;;  %v2568_v38 = vld [vmem:[#allocation13 + $0x74] sm:$0xf]  ;;  %v2130_v39 = vld [vmem:[#allocation13 + $0x78] sm:$0xf0] }
  0x5f   :  { %748 = vmatpush.bf16.msrb.mxu0 %v1989_v13  ;;  %v2029_v5 = vor.u32 %v2542_v2, %v2026_v4  ;;  %v1954_v13 = vld [vmem:[#allocation10 + $0x18] sm:$0xf0]  ;;  %v2120_v44 = vld [vmem:[#allocation13 + $0x60] sm:$0xf]  ;;  %v2567_v46 = vld [vmem:[#allocation13 + $0x64] sm:$0xf0] }
  0x60   :  { %v1957_v18 = vor.u32 %v2524_v11, %v1954_v13  ;;  %v2194_v43 = vld [vmem:[#allocation13 + $0xf8] sm:$0xf0]  ;;  %v2184_v47 = vld [vmem:[#allocation13 + $0xe0] sm:$0xf]  ;;  %v2583_v48 = vld [vmem:[#allocation13 + $0xe4] sm:$0xf0] }
  0x61   :  { %722 = vmatpush.bf16.msra.mxu2 %v1985_v8  ;;  %735 = vmatpush.bf16.msra.mxu3 %v2049_v12  ;;  %v1953_v8 = vor.u32 %v2525_v7, %v1952_v6  ;;  %v2017_v12 = vor.u32 %v2541_v10, %v2016_v9  ;;  %v2185_v50 = vor.u32 %v2583_v48, %v2184_v47  ;;  %v2566_v51 = vld [vmem:[#allocation13 + $0x64] sm:$0xf]  ;;  %v2122_v52 = vld [vmem:[#allocation13 + $0x68] sm:$0xf0]  ;;  %v2112_v56 = vld [vmem:[#allocation13 + $0x50] sm:$0xf] }
  0x62   :  { %761 = vmatpush.bf16.msrb.mxu1 %v2053_v14  ;;  %v2540_v14 = vld [vmem:[#allocation10 + $0x94] sm:$0xf]  ;;  %v2186_v55 = vld [vmem:[#allocation13 + $0xe8] sm:$0xf0]  ;;  %v2581_v60 = vld [vmem:[#allocation13 + $0xd4] sm:$0xf0]  ;;  %v509_v7 = vpack.i.b16 %v3277_v16, %v3277_v16 }
  0x63   :  { %749 = vmatpush.bf16.msrb.mxu0 %v1981_v42  ;;  %v2584_v42 = vld [vmem:[#allocation13 + $0xf4] sm:$0xf]  ;;  %v2176_v59 = vld [vmem:[#allocation13 + $0xd0] sm:$0xf]  ;;  %v2178_v1 = vld [vmem:[#allocation13 + $0xd8] sm:$0xf0] }
  0x64   :  { %v2580_v0 = vld [vmem:[#allocation13 + $0xd4] sm:$0xf]  ;;  %v2177_v2 = vor.u32 %v2581_v60, %v2176_v59  ;;  %v511_v9 = vperm.slane %v509_v7, 0  ;;  %v2098_v48 = vld [vmem:[#allocation13 + $0x38] sm:$0xf0]  ;;  %s2937_s11 = smov [#allocation17]  }
  0x65   :  { %723 = vmatpush.bf16.msra.mxu2 %v1977_v37  ;;  %736 = vmatpush.bf16.msra.mxu3 %v2041_v41  ;;  %v2585_v37 = vld [vmem:[#allocation13 + $0xf4] sm:$0xf0]  ;;  %v2133_v41 = vor.u32 %v2568_v38, %v2130_v39  ;;  %v2181_v4 = vor.u32 %v2580_v0, %v2178_v1  ;;  %v2578_v39 = vld [vmem:[#allocation13 + $0xc4] sm:$0xf]  ;;  %v2560_v47 = vld [vmem:[#allocation13 + $0x34] sm:$0xf] }
  0x66   :  { %762 = vmatpush.bf16.msrb.mxu1 %v2045_v45  ;;  %v2193_v40 = vor.u32 %v2585_v37, %v2192_v35  ;;  %v2197_v45 = vor.u32 %v2584_v42, %v2194_v43  ;;  %v2562_v35 = vld [vmem:[#allocation13 + $0x44] sm:$0xf]  ;;  %v2096_v42 = vld [vmem:[#allocation13 + $0x30] sm:$0xf]  ;;  %v2561_v43 = vld [vmem:[#allocation13 + $0x34] sm:$0xf0] }
  0x67   :  { %750 = vmatpush.bf16.msrb.mxu0 %v1973_v54  ;;  %v2125_v54 = vor.u32 %v2566_v51, %v2122_v52  ;;  %v2576_v51 = vld [vmem:[#allocation13 + $0xb4] sm:$0xf]  ;;  %v2162_v52 = vld [vmem:[#allocation13 + $0xb8] sm:$0xf0]  ;;  %v2558_v60 = vld [vmem:[#allocation13 + $0x24] sm:$0xf] }
  0x68   :  { %v2154_v0 = vld [vmem:[#allocation13 + $0xa8] sm:$0xf0]  ;;  %v2556_v7 = vld [vmem:[#allocation13 + $0x14] sm:$0xf]  ;;  %s1788_s7 = sshll.u32 %s2937_s11, 4  ;;  %s1790_s28 = sshll.u32 %s3473_s18, 4  ;;  %s1789_s7 = int_to_ptr.vmem [resolvable:$true] %s1788_s7  ;;  %s1791_s28 = int_to_ptr.hbm [resolvable:$true] %s1790_s28 }
  0x69   :  { %724 = vmatpush.bf16.msra.mxu2 %v1969_v49  ;;  %737 = vmatpush.bf16.msra.mxu3 %v2033_v53  ;;  %v2121_v49 = vor.u32 %v2567_v46, %v2120_v44  ;;  %v2582_v53 = vld [vmem:[#allocation13 + $0xe4] sm:$0xf]  ;;  %v2160_v44 = vld [vmem:[#allocation13 + $0xb0] sm:$0xf]  ;;  %v2577_v46 = vld [vmem:[#allocation13 + $0xb4] sm:$0xf0] }
  0x6a   :  { %763 = vmatpush.bf16.msrb.mxu1 %v2037_v57  ;;  %v2565_v57 = vld [vmem:[#allocation13 + $0x54] sm:$0xf0]  ;;  %v2189_v58 = vor.u32 %v2582_v53, %v2186_v55  ;;  %v2165_v53 = vor.u32 %v2576_v51, %v2162_v52  ;;  %v2559_v55 = vld [vmem:[#allocation13 + $0x24] sm:$0xf0]  ;;  %v2314_v51 = vld [vmem:[#allocation14 + $0xe8] sm:$0xf0] }
  0x6b   :  { %751 = vmatpush.bf16.msrb.mxu0 %v1965_v3  ;;  %v2113_v62 = vor.u32 %v2565_v57, %v2112_v56  ;;  %v2152_v56 = vld [vmem:[#allocation13 + $0xa0] sm:$0xf]  ;;  %v2240_v52 = vld [vmem:[#allocation14 + $0x50] sm:$0xf]  ;;  %vm1779_vm4 = vcmask 326656  }
  0x6d   :  { %725 = vmatpush.bf16.msra.mxu2 %v1961_v61  ;;  %738 = vmatpush.bf16.msra.mxu3 %v2025_v63  ;;  %v2564_v61 = vld [vmem:[#allocation13 + $0x54] sm:$0xf]  ;;  %v2114_v63 = vld [vmem:[#allocation13 + $0x58] sm:$0xf0] }
  0x6e   :  { %764 = vmatpush.bf16.msrb.mxu1 %v2029_v5  ;;  %v2117_v3 = vor.u32 %v2564_v61, %v2114_v63  ;;  %v2090_v61 = vld [vmem:[#allocation13 + $0x28] sm:$0xf0] }
  0x6f   :  { %752 = vmatpush.bf16.msrb.mxu0 %v1957_v18  ;;  %v517_v18 = vunpack.c.l.bf16 %v511_v9  ;;  %v2093_v63 = vor.u32 %v2558_v60, %v2090_v61  ;;  %v2082_v9 = vld [vmem:[#allocation13 + $0x18] sm:$0xf0]  ;;  %v2612_v60 = vld [vmem:[#allocation14 + $0xd4] sm:$0xf] }
  0x70   :  { %v2306_v61 = vld [vmem:[#allocation14 + $0xd8] sm:$0xf0] }
  0x71   :  { %726 = vmatpush.bf16.msra.mxu2 %v1953_v8  ;;  %739 = vmatpush.bf16.msra.mxu3 %v2017_v12  ;;  %v512_v8 = vpack.i.b16 %v3279_v17, %v3279_v17 }
  0x73   :  { %v514_v10 = vperm.slane %v512_v8, 0 }
  0xbb   :  { %v217_v19 = vpop.f32.mrf.mxu2  ;;  %v230_v20 = vpop.f32.mrf.mxu3 }
  0xbc   :  { %v234_v21 = vpack.c.bf16 %v230_v20, %v217_v19  ;;  %v2021_v19 = vor.u32 %v2540_v14, %v2018_v15  ;;  %v1944_v20 = vld [vmem:[#allocation10] sm:$0xf] }
  0xbe   :  { %v246_v24 = vunpack.c.l.bf16 %v234_v21  ;;  %v247_v25 = vunpack.c.h.bf16 %v234_v21  ;;  %v2523_v21 = vld [vmem:[#allocation10 + $0x4] sm:$0xf0]  ;;  %765 = vmatpush.bf16.msrb.mxu1 %v2021_v19  ;;  %v518_v19 = vunpack.c.l.bf16 %v514_v10  ;;  %v2572_v10 = vld [vmem:[#allocation13 + $0x94] sm:$0xf] }
  0xc0   :  { %v250_v28 = vadd.f32 %v248_v22, %v246_v24  ;;  %v251_v29 = vadd.f32 %v249_v23, %v247_v25  ;;  %v2008_v22 = vld [vmem:[#allocation10 + $0x80] sm:$0xf]  ;;  %v1945_v24 = vor.u32 %v2523_v21, %v1944_v20  ;;  %v2539_v25 = vld [vmem:[#allocation10 + $0x84] sm:$0xf0] }
  0xc1   :  { %v773_v23 = vld [vmem:[#allocation11] sm:$0x3] }
  0xc2   :  { %v255_v31 = vmax.f32 %v250_v28, 0.0  ;;  %v256_v32 = vmax.f32 %v251_v29, 0.0  ;;  %v2522_v28 = vld [vmem:[#allocation10 + $0x4] sm:$0xf]  ;;  %775 = vst [vmem:[#allocation1] ss:$9 sm:$0xff] %v773_v23  ;;  %v2009_v29 = vor.u32 %v2539_v25, %v2008_v22  ;;  %727 = vmatpush.bf16.msra.mxu2 %v1945_v24 }
  0xc3   :  { %v219_v30 = vpop.f32.mrf.mxu2  ;;  %v232_v33 = vpop.f32.mrf.mxu3 }
  0xc4   :  { %v257_v26 = vpack.c.bf16 %v255_v31, %v255_v31  ;;  %v258_v34 = vpack.c.bf16 %v256_v32, %v256_v32  ;;  %v1946_v30 = vld [vmem:[#allocation10 + $0x8] sm:$0xf0]  ;;  %v2538_v31 = vld [vmem:[#allocation10 + $0x84] sm:$0xf]  ;;  %740 = vmatpush.bf16.msra.mxu3 %v2009_v29 }
  0xc5   :  { %v1949_v32 = vor.u32 %v2522_v28, %v1946_v30  ;;  %v2010_v33 = vld [vmem:[#allocation10 + $0x88] sm:$0xf0] }
  0xc6   :  { %459 = vmatmul.bf16.vlgmr.msrb.gmra.mxu2 %v257_v26  ;;  %472 = vmatmul.bf16.vlgmr.msrb.gmra.mxu3 %v258_v34 }
  0xc7   :  { %485 = vmatmul.bf16.vlgmr.msra.gmra.mxu0 %v257_v26  ;;  %498 = vmatmul.bf16.vlgmr.msra.gmra.mxu1 %v258_v34  ;;  %v2013_v26 = vor.u32 %v2538_v31, %v2010_v33  ;;  %v2128_v34 = vld [vmem:[#allocation13 + $0x70] sm:$0xf]  ;;  %v2563_v33 = vld [vmem:[#allocation13 + $0x44] sm:$0xf0] }
  0xc8   :  { %753 = vmatpush.bf16.msrb.mxu0 %v1949_v32  ;;  %v2129_v36 = vor.u32 %v2569_v27, %v2128_v34  ;;  %1002 = vmatpush.bf16.msrb.mxu3 %v2193_v40  ;;  %v2104_v32 = vld [vmem:[#allocation13 + $0x40] sm:$0xf]  ;;  %v2579_v27 = vld [vmem:[#allocation13 + $0xc4] sm:$0xf0]  ;;  %v2170_v40 = vld [vmem:[#allocation13 + $0xc8] sm:$0xf0] }
  0xc9   :  { %766 = vmatpush.bf16.msrb.mxu1 %v2013_v26  ;;  %v2168_v26 = vld [vmem:[#allocation13 + $0xc0] sm:$0xf]  ;;  %v2105_v34 = vor.u32 %v2563_v33, %v2104_v32  ;;  %v2601_v32 = vld [vmem:[#allocation14 + $0x74] sm:$0xf0]  ;;  %v2320_v33 = vld [vmem:[#allocation14 + $0xf0] sm:$0xf] }
  0xca   :  { %989 = vmatpush.bf16.msrb.mxu2 %v2129_v36  ;;  %v2106_v36 = vld [vmem:[#allocation13 + $0x48] sm:$0xf0]  ;;  %v2169_v37 = vor.u32 %v2579_v27, %v2168_v26  ;;  %v2600_v27 = vld [vmem:[#allocation14 + $0x74] sm:$0xf] }
  0xcb   :  { %v2109_v38 = vor.u32 %v2562_v35, %v2106_v36  ;;  %v2258_v35 = vld [vmem:[#allocation14 + $0x78] sm:$0xf0] }
  0xcc   :  { %1015 = vmatpush.bf16.msra.mxu0 %v2133_v41  ;;  %1003 = vmatpush.bf16.msrb.mxu3 %v2185_v50  ;;  %v2173_v41 = vor.u32 %v2578_v39, %v2170_v40  ;;  %v2101_v50 = vor.u32 %v2560_v47, %v2098_v48  ;;  %v2322_v39 = vld [vmem:[#allocation14 + $0xf8] sm:$0xf0]  ;;  %v2248_v40 = vld [vmem:[#allocation14 + $0x60] sm:$0xf]  ;;  %v2598_v47 = vld [vmem:[#allocation14 + $0x64] sm:$0xf] }
  0xcd   :  { %1028 = vmatpush.bf16.msra.mxu1 %v2197_v45  ;;  %v2097_v45 = vor.u32 %v2561_v43, %v2096_v42  ;;  %v2599_v42 = vld [vmem:[#allocation14 + $0x64] sm:$0xf0]  ;;  %v2312_v43 = vld [vmem:[#allocation14 + $0xe0] sm:$0xf]  ;;  %v2250_v48 = vld [vmem:[#allocation14 + $0x68] sm:$0xf0] }
  0xce   :  { %990 = vmatpush.bf16.msrb.mxu2 %v2121_v49  ;;  %v2161_v49 = vor.u32 %v2577_v46, %v2160_v44  ;;  %v2615_v44 = vld [vmem:[#allocation14 + $0xe4] sm:$0xf0] }
  0xcf   :  { %v2313_v46 = vor.u32 %v2615_v44, %v2312_v43  ;;  %v2592_v43 = vld [vmem:[#allocation14 + $0x34] sm:$0xf]  ;;  %v2226_v44 = vld [vmem:[#allocation14 + $0x38] sm:$0xf0] }
  0xd0   :  { %1016 = vmatpush.bf16.msra.mxu0 %v2125_v54  ;;  %1004 = vmatpush.bf16.msrb.mxu3 %v2177_v2  ;;  %v2088_v54 = vld [vmem:[#allocation13 + $0x20] sm:$0xf]  ;;  %v2080_v2 = vld [vmem:[#allocation13 + $0x10] sm:$0xf] }
  0xd1   :  { %1029 = vmatpush.bf16.msra.mxu1 %v2189_v58  ;;  %v2089_v57 = vor.u32 %v2559_v55, %v2088_v54  ;;  %v2575_v58 = vld [vmem:[#allocation13 + $0xa4] sm:$0xf0]  ;;  %v2304_v55 = vld [vmem:[#allocation14 + $0xd0] sm:$0xf] }
  0xd2   :  { %991 = vmatpush.bf16.msrb.mxu2 %v2113_v62  ;;  %v2153_v59 = vor.u32 %v2575_v58, %v2152_v56  ;;  %v2574_v62 = vld [vmem:[#allocation13 + $0xa4] sm:$0xf]  ;;  %v2613_v56 = vld [vmem:[#allocation14 + $0xd4] sm:$0xf0] }
  0xd3   :  { %v2157_v1 = vor.u32 %v2574_v62, %v2154_v0  ;;  %v2305_v62 = vor.u32 %v2613_v56, %v2304_v55  ;;  %v2309_v0 = vor.u32 %v2612_v60, %v2306_v61  ;;  %v2590_v56 = vld [vmem:[#allocation14 + $0x24] sm:$0xf]  ;;  %v2282_v60 = vld [vmem:[#allocation14 + $0xa8] sm:$0xf0] }
  0xd4   :  { %1017 = vmatpush.bf16.msra.mxu0 %v2117_v3  ;;  %1005 = vmatpush.bf16.msrb.mxu3 %v2169_v37  ;;  %v2557_v3 = vld [vmem:[#allocation13 + $0x14] sm:$0xf0]  ;;  %v2261_v37 = vor.u32 %v2600_v27, %v2258_v35  ;;  %v2610_v35 = vld [vmem:[#allocation14 + $0xc4] sm:$0xf] }
  0xd5   :  { %1030 = vmatpush.bf16.msra.mxu1 %v2181_v4  ;;  %v2081_v4 = vor.u32 %v2557_v3, %v2080_v2 }
  0xd6   :  { %992 = vmatpush.bf16.msrb.mxu2 %v2105_v34  ;;  %v2617_v34 = vld [vmem:[#allocation14 + $0xf4] sm:$0xf0] }
  0xd7   :  { %v2321_v36 = vor.u32 %v2617_v34, %v2320_v33  ;;  %v2594_v33 = vld [vmem:[#allocation14 + $0x44] sm:$0xf] }
  0xd8   :  { %1018 = vmatpush.bf16.msra.mxu0 %v2109_v38  ;;  %1006 = vmatpush.bf16.msrb.mxu3 %v2161_v49  ;;  %v2616_v38 = vld [vmem:[#allocation14 + $0xf4] sm:$0xf]  ;;  %v2614_v49 = vld [vmem:[#allocation14 + $0xe4] sm:$0xf] }
  0xd9   :  { %1031 = vmatpush.bf16.msra.mxu1 %v2173_v41  ;;  %v2325_v41 = vor.u32 %v2616_v38, %v2322_v39  ;;  %v2317_v54 = vor.u32 %v2614_v49, %v2314_v51  ;;  %v2224_v38 = vld [vmem:[#allocation14 + $0x30] sm:$0xf]  ;;  %v2593_v39 = vld [vmem:[#allocation14 + $0x34] sm:$0xf0]  ;;  %v2591_v51 = vld [vmem:[#allocation14 + $0x24] sm:$0xf0] }
  0xda   :  { %993 = vmatpush.bf16.msrb.mxu2 %v2097_v45  ;;  %v2249_v45 = vor.u32 %v2599_v42, %v2248_v40  ;;  %v2288_v40 = vld [vmem:[#allocation14 + $0xb0] sm:$0xf]  ;;  %v2609_v42 = vld [vmem:[#allocation14 + $0xb4] sm:$0xf0] }
  0xdc   :  { %1019 = vmatpush.bf16.msra.mxu0 %v2101_v50  ;;  %1007 = vmatpush.bf16.msrb.mxu3 %v2153_v59  ;;  %v2253_v50 = vor.u32 %v2598_v47, %v2250_v48  ;;  %v2242_v59 = vld [vmem:[#allocation14 + $0x58] sm:$0xf0]  ;;  %v2608_v47 = vld [vmem:[#allocation14 + $0xb4] sm:$0xf] }
  0xdd   :  { %1032 = vmatpush.bf16.msra.mxu1 %v2165_v53  ;;  %v2597_v53 = vld [vmem:[#allocation14 + $0x54] sm:$0xf0]  ;;  %v2290_v48 = vld [vmem:[#allocation14 + $0xb8] sm:$0xf0] }
  0xde   :  { %994 = vmatpush.bf16.msrb.mxu2 %v2089_v57  ;;  %v2596_v57 = vld [vmem:[#allocation14 + $0x54] sm:$0xf]  ;;  %v2241_v58 = vor.u32 %v2597_v53, %v2240_v52  ;;  %v2293_v49 = vor.u32 %v2608_v47, %v2290_v48  ;;  %v2280_v52 = vld [vmem:[#allocation14 + $0xa0] sm:$0xf] }
  0xe0   :  { %1020 = vmatpush.bf16.msra.mxu0 %v2093_v63  ;;  %v2245_v63 = vor.u32 %v2596_v57, %v2242_v59  ;;  %v2218_v57 = vld [vmem:[#allocation14 + $0x28] sm:$0xf0] }
  0xe1   :  { %1033 = vmatpush.bf16.msra.mxu1 %v2157_v1  ;;  %v2221_v59 = vor.u32 %v2590_v56, %v2218_v57  ;;  %v2622_v56 = vld [vmem:[%s3467_s12 + $0x20] sm:$0xff] }
  0xe2   :  { %995 = vmatpush.bf16.msrb.mxu2 %v2081_v4  ;;  %v2630_v57 = vld [vmem:[%s3467_s12 + $0x60] sm:$0xff] }
 0x144   :  { %v486_v5 = vpop.f32.mrf.mxu0  ;;  %v499_v6 = vpop.f32.mrf.mxu1 }
 0x145   :  { %v500_v13 = vadd.f32 %v499_v6, %v486_v5  ;;  %v2144_v5 = vld [vmem:[#allocation13 + $0x90] sm:$0xf]  ;;  %v2573_v6 = vld [vmem:[#allocation13 + $0x94] sm:$0xf0] }
 0x146   :  { %v2145_v8 = vor.u32 %v2573_v6, %v2144_v5 }
 0x148   :  { %1008 = vmatpush.bf16.msrb.mxu3 %v2145_v8 }
 0x149   :  { %v460_v11 = vpop.f32.mrf.mxu2  ;;  %v473_v12 = vpop.f32.mrf.mxu3 }
 0x14a   :  { %v474_v14 = vadd.f32 %v473_v12, %v460_v11  ;;  %v2146_v11 = vld [vmem:[#allocation13 + $0x98] sm:$0xf0] }
 0x14b   :  { %v3285_v12 = vld [vmem:[#allocation1] sm:$0xff] }
 0x14c   :  { %v503_v15 = vpack.c.bf16 %v500_v13, %v474_v14  ;;  %v488_v20 = vpop.f32.mrf.mxu0  ;;  %v501_v21 = vpop.f32.mrf.mxu1  ;;  %v3287_v13 = vld [vmem:[#allocation1 + $0x9] sm:$0xff]  ;;  %v2085_v14 = vor.u32 %v2556_v7, %v2082_v9  ;;  %v778_v3 = vpack.i.b16 %v3285_v12, %v3285_v12 }
 0x14d   :  { %v2136_v20 = vld [vmem:[#allocation13 + $0x80] sm:$0xf]  ;;  %v1042_v21 = vld [vmem:[%s3464_s9] sm:$0x3]  ;;  %v781_v4 = vpack.i.b16 %v3287_v13, %v3287_v13 }
 0x14e   :  { %v515_v22 = vunpack.c.l.bf16 %v503_v15  ;;  %v516_v23 = vunpack.c.h.bf16 %v503_v15  ;;  %v2149_v15 = vor.u32 %v2572_v10, %v2146_v11  ;;  %1021 = vmatpush.bf16.msra.mxu0 %v2085_v14  ;;  %1044 = vst [vmem:[#allocation1] ss:$9 sm:$0xff] %v1042_v21  ;;  %v780_v5 = vperm.slane %v778_v3, 0  ;;  %v2588_v3 = vld [vmem:[#allocation14 + $0x14] sm:$0xf] }
 0x14f   :  { %v783_v6 = vperm.slane %v781_v4, 0 }
 0x150   :  { %v519_v24 = vadd.f32 %v517_v18, %v515_v22  ;;  %v520_v25 = vadd.f32 %v518_v19, %v516_v23  ;;  %v2072_v18 = vld [vmem:[#allocation13] sm:$0xf]  ;;  %v2555_v19 = vld [vmem:[#allocation13 + $0x4] sm:$0xf0]  ;;  %1034 = vmatpush.bf16.msra.mxu1 %v2149_v15  ;;  %v786_v14 = vunpack.c.l.bf16 %v780_v5  ;;  %v2210_v5 = vld [vmem:[#allocation14 + $0x18] sm:$0xf0] }
 0x151   :  { %v462_v16 = vpop.f32.mrf.mxu2  ;;  %v475_v28 = vpop.f32.mrf.mxu3  ;;  %v2073_v22 = vor.u32 %v2555_v19, %v2072_v18  ;;  %v2571_v23 = vld [vmem:[#allocation13 + $0x84] sm:$0xf0]  ;;  %v787_v15 = vunpack.c.l.bf16 %v783_v6  ;;  %v2604_v6 = vld [vmem:[#allocation14 + $0x94] sm:$0xf] }
 0x152   :  { %v524_v29 = vmax.f32 %v519_v24, 0.0  ;;  %v525_v17 = vmax.f32 %v520_v25, 0.0  ;;  %v2554_v24 = vld [vmem:[#allocation13 + $0x4] sm:$0xf]  ;;  %v2137_v25 = vor.u32 %v2571_v23, %v2136_v20  ;;  %v2074_v16 = vld [vmem:[#allocation13 + $0x8] sm:$0xf0] }
 0x153   :  { %v2570_v28 = vld [vmem:[#allocation13 + $0x84] sm:$0xf]  ;;  %996 = vmatpush.bf16.msrb.mxu2 %v2073_v22 }
 0x154   :  { %v526_v30 = vpack.c.bf16 %v524_v29, %v524_v29  ;;  %v527_v31 = vpack.c.bf16 %v525_v17, %v525_v17  ;;  %v2077_v29 = vor.u32 %v2554_v24, %v2074_v16  ;;  %v2138_v17 = vld [vmem:[#allocation13 + $0x88] sm:$0xf0]  ;;  %1009 = vmatpush.bf16.msrb.mxu3 %v2137_v25 }
 0x156   :  { %728 = vmatmul.bf16.vlgmr.msra.gmra.mxu2 %v526_v30  ;;  %741 = vmatmul.bf16.vlgmr.msra.gmra.mxu3 %v527_v31 }
 0x157   :  { %754 = vmatmul.bf16.vlgmr.msrb.gmra.mxu0 %v526_v30  ;;  %767 = vmatmul.bf16.vlgmr.msrb.gmra.mxu1 %v527_v31  ;;  %v2141_v30 = vor.u32 %v2570_v28, %v2138_v17  ;;  %v2256_v31 = vld [vmem:[#allocation14 + $0x70] sm:$0xf]  ;;  %v2595_v17 = vld [vmem:[#allocation14 + $0x44] sm:$0xf0] }
 0x158   :  { %1022 = vmatpush.bf16.msra.mxu0 %v2077_v29  ;;  %v2257_v26 = vor.u32 %v2601_v32, %v2256_v31  ;;  %1271 = vmatpush.bf16.msra.mxu3 %v2321_v36  ;;  %v2232_v29 = vld [vmem:[#allocation14 + $0x40] sm:$0xf]  ;;  %v2611_v32 = vld [vmem:[#allocation14 + $0xc4] sm:$0xf0]  ;;  %v2298_v36 = vld [vmem:[#allocation14 + $0xc8] sm:$0xf0] }
 0x159   :  { %1035 = vmatpush.bf16.msra.mxu1 %v2141_v30  ;;  %v2296_v30 = vld [vmem:[#allocation14 + $0xc0] sm:$0xf]  ;;  %v2233_v31 = vor.u32 %v2595_v17, %v2232_v29  ;;  %v2633_v29 = vld [vmem:[%s3467_s12 + $0x78] sm:$0xff]  ;;  %v2624_v17 = vld [vmem:[%s3467_s12 + $0x30] sm:$0xff] }
 0x15a   :  { %1258 = vmatpush.bf16.msra.mxu2 %v2257_v26  ;;  %v2234_v26 = vld [vmem:[#allocation14 + $0x48] sm:$0xf0]  ;;  %v2297_v34 = vor.u32 %v2611_v32, %v2296_v30 }
 0x15b   :  { %v2237_v27 = vor.u32 %v2594_v33, %v2234_v26  ;;  %v2632_v30 = vld [vmem:[%s3467_s12 + $0x70] sm:$0xff]  ;;  %v2631_v32 = vld [vmem:[%s3467_s12 + $0x68] sm:$0xff] }
 0x15c   :  { %1284 = vmatpush.bf16.msrb.mxu0 %v2261_v37  ;;  %1272 = vmatpush.bf16.msra.mxu3 %v2313_v46  ;;  %v2301_v37 = vor.u32 %v2610_v35, %v2298_v36  ;;  %v2229_v46 = vor.u32 %v2592_v43, %v2226_v44 }
 0x15d   :  { %1297 = vmatpush.bf16.msrb.mxu1 %v2325_v41  ;;  %v2225_v41 = vor.u32 %v2593_v39, %v2224_v38 }
 0x15e   :  { %1259 = vmatpush.bf16.msra.mxu2 %v2249_v45  ;;  %v2289_v45 = vor.u32 %v2609_v42, %v2288_v40 }
 0x160   :  { %1285 = vmatpush.bf16.msrb.mxu0 %v2253_v50  ;;  %1273 = vmatpush.bf16.msra.mxu3 %v2305_v62  ;;  %v2216_v50 = vld [vmem:[#allocation14 + $0x20] sm:$0xf]  ;;  %v2208_v62 = vld [vmem:[#allocation14 + $0x10] sm:$0xf] }
 0x161   :  { %1298 = vmatpush.bf16.msrb.mxu1 %v2317_v54  ;;  %v2217_v53 = vor.u32 %v2591_v51, %v2216_v50  ;;  %v2607_v54 = vld [vmem:[#allocation14 + $0xa4] sm:$0xf0] }
 0x162   :  { %1260 = vmatpush.bf16.msra.mxu2 %v2241_v58  ;;  %v2281_v55 = vor.u32 %v2607_v54, %v2280_v52  ;;  %v2606_v58 = vld [vmem:[#allocation14 + $0xa4] sm:$0xf] }
 0x163   :  { %v2285_v61 = vor.u32 %v2606_v58, %v2282_v60  ;;  %v2621_v58 = vld [vmem:[%s3467_s12 + $0x18] sm:$0xff]  ;;  %v2620_v60 = vld [vmem:[%s3467_s12 + $0x10] sm:$0xff] }
 0x164   :  { %1286 = vmatpush.bf16.msrb.mxu0 %v2245_v63  ;;  %1274 = vmatpush.bf16.msra.mxu3 %v2297_v34  ;;  %v2589_v63 = vld [vmem:[#allocation14 + $0x14] sm:$0xf0] }
 0x165   :  { %1299 = vmatpush.bf16.msrb.mxu1 %v2309_v0  ;;  %v2209_v0 = vor.u32 %v2589_v63, %v2208_v62  ;;  %v2619_v62 = vld [vmem:[%s3467_s12 + $0x8] sm:$0xff] }
 0x166   :  { %1261 = vmatpush.bf16.msra.mxu2 %v2233_v31  ;;  %v2623_v31 = vld [vmem:[%s3467_s12 + $0x28] sm:$0xff] }
 0x167   :  { %v2627_v63 = vld [vmem:[%s3467_s12 + $0x48] sm:$0xff] }
 0x168   :  { %1287 = vmatpush.bf16.msrb.mxu0 %v2237_v27  ;;  %1275 = vmatpush.bf16.msra.mxu3 %v2289_v45 }
 0x169   :  { %1300 = vmatpush.bf16.msrb.mxu1 %v2301_v37 }
 0x16a   :  { %1262 = vmatpush.bf16.msra.mxu2 %v2225_v41 }
 0x16c   :  { %1288 = vmatpush.bf16.msrb.mxu0 %v2229_v46  ;;  %1276 = vmatpush.bf16.msra.mxu3 %v2281_v55 }
 0x16d   :  { %1301 = vmatpush.bf16.msrb.mxu1 %v2293_v49 }
 0x16e   :  { %1263 = vmatpush.bf16.msra.mxu2 %v2217_v53 }
 0x170   :  { %1289 = vmatpush.bf16.msrb.mxu0 %v2221_v59  ;;  %v2629_v59 = vld [vmem:[%s3467_s12 + $0x58] sm:$0xff] }
 0x171   :  { %1302 = vmatpush.bf16.msrb.mxu1 %v2285_v61  ;;  %v2628_v61 = vld [vmem:[%s3467_s12 + $0x50] sm:$0xff] }
 0x172   :  { %1264 = vmatpush.bf16.msra.mxu2 %v2209_v0  ;;  %v2618_v0 = vld [vmem:[%s3467_s12] sm:$0xff] }
 0x1d4   :  { %v755_v1 = vpop.f32.mrf.mxu0  ;;  %v768_v2 = vpop.f32.mrf.mxu1 }
 0x1d5   :  { %v769_v9 = vadd.f32 %v768_v2, %v755_v1  ;;  %v2272_v1 = vld [vmem:[#allocation14 + $0x90] sm:$0xf]  ;;  %v2605_v2 = vld [vmem:[#allocation14 + $0x94] sm:$0xf0] }
 0x1d6   :  { %v2273_v4 = vor.u32 %v2605_v2, %v2272_v1  ;;  %v2626_v1 = vld [vmem:[%s3467_s12 + $0x40] sm:$0xff]  ;;  %v1495_v2 = vld [vmem:[#allocation2] sm:$0xf] }
 0x1d8   :  { %1277 = vmatpush.bf16.msra.mxu3 %v2273_v4  ;;  %v1497_v4 = vunpack.c.l.b16 %v1495_v2  ;;  %v2656_v2 = vld [vmem:[%s3471_s16 + $0x70] sm:$0xff] }
 0x1d9   :  { %v729_v7 = vpop.f32.mrf.mxu2  ;;  %v742_v8 = vpop.f32.mrf.mxu3 }
 0x1da   :  { %v743_v10 = vadd.f32 %v742_v8, %v729_v7  ;;  %v2274_v7 = vld [vmem:[#allocation14 + $0x98] sm:$0xf0] }
 0x1db   :  { %v1045_v8 = vld [vmem:[#allocation1] sm:$0xff] }
 0x1dc   :  { %v772_v11 = vpack.c.bf16 %v769_v9, %v743_v10  ;;  %v757_v18 = vpop.f32.mrf.mxu0  ;;  %v770_v19 = vpop.f32.mrf.mxu1  ;;  %v1046_v9 = vld [vmem:[#allocation1 + $0x9] sm:$0xff]  ;;  %v2213_v10 = vor.u32 %v2588_v3, %v2210_v5  ;;  %v1047_v34 = vpack.i.b16 %v1045_v8, %v1045_v8  ;;  %v1513_v3 = vld [vmem:[%s3469_s14 + $0x40] sm:$0xff]  ;;  %v1498_v8 = vpack.c.b16 %v1497_v4, %v1497_v4 }
 0x1dd   :  { %v2264_v18 = vld [vmem:[#allocation14 + $0x80] sm:$0xf]  ;;  %v1050_v27 = vpack.i.b16 %v1046_v9, %v1046_v9  ;;  %v1539_v5 = vunpack.c.l.b16 %v1513_v3  ;;  %v2655_v4 = vld [vmem:[%s3471_s16 + $0x68] sm:$0xff] }
 0x1de   :  { %v784_v20 = vunpack.c.l.bf16 %v772_v11  ;;  %v785_v21 = vunpack.c.h.bf16 %v772_v11  ;;  %v2277_v11 = vor.u32 %v2604_v6, %v2274_v7  ;;  %v1311_v19 = vld [vmem:[#allocation16] sm:$0x3]  ;;  %1290 = vmatpush.bf16.msrb.mxu0 %v2213_v10  ;;  %v1049_v35 = vperm.slane %v1047_v34, 0  ;;  %v2416_v7 = vld [vmem:[%s3469_s14 + $0x30] sm:$0xf]  ;;  %1499 = vrot.lane.b32.xlu0 %v1498_v8, %s2936_s23  ;;  %v2653_v8 = vld [vmem:[%s3471_s16 + $0x58] sm:$0xff] }
 0x1df   :  { %1313 = vst [vmem:[#allocation1] ss:$9 sm:$0xff] %v1311_v19  ;;  %v1052_v36 = vperm.slane %v1050_v27, 0  ;;  %v1540_v6 = vunpack.c.h.b16 %v1513_v3  ;;  %v1549_v9 = vpack.c.b16 %v1539_v5, %v1539_v5  ;;  %v2647_v3 = vld [vmem:[%s3471_s16 + $0x28] sm:$0xff]  ;;  %v2646_v5 = vld [vmem:[%s3471_s16 + $0x20] sm:$0xff] }
 0x1e0   :  { %v788_v22 = vadd.f32 %v786_v14, %v784_v20  ;;  %v789_v23 = vadd.f32 %v787_v15, %v785_v21  ;;  %v2200_v14 = vld [vmem:[#allocation14] sm:$0xf]  ;;  %v2587_v15 = vld [vmem:[#allocation14 + $0x4] sm:$0xf0]  ;;  %1303 = vmatpush.bf16.msrb.mxu1 %v2277_v11  ;;  %v1055_v42 = vunpack.c.l.bf16 %v1049_v35  ;;  %v2641_v11 = vld [vmem:[%s3469_s14 + $0x34] sm:$0xf0] }
 0x1e1   :  { %v731_v12 = vpop.f32.mrf.mxu2  ;;  %v744_v24 = vpop.f32.mrf.mxu3  ;;  %v2201_v20 = vor.u32 %v2587_v15, %v2200_v14  ;;  %v2603_v21 = vld [vmem:[#allocation14 + $0x84] sm:$0xf0]  ;;  %v1056_v43 = vunpack.c.l.bf16 %v1052_v36  ;;  %v1550_v10 = vpack.c.b16 %v1540_v6, %v1540_v6  ;;  %v2640_v14 = vld [vmem:[%s3469_s14 + $0x34] sm:$0xf]  ;;  %v2418_v15 = vld [vmem:[%s3469_s14 + $0x38] sm:$0xf0] }
 0x1e2   :  { %v793_v25 = vmax.f32 %v788_v22, 0.0  ;;  %v794_v13 = vmax.f32 %v789_v23, 0.0  ;;  %v2586_v22 = vld [vmem:[#allocation14 + $0x4] sm:$0xf]  ;;  %v2265_v23 = vor.u32 %v2603_v21, %v2264_v18  ;;  %v2202_v12 = vld [vmem:[#allocation14 + $0x8] sm:$0xf0]  ;;  %v2421_v21 = vor.u32 %v2640_v14, %v2418_v15 }
 0x1e3   :  { %v2602_v24 = vld [vmem:[#allocation14 + $0x84] sm:$0xf]  ;;  %1265 = vmatpush.bf16.msra.mxu2 %v2201_v20  ;;  %v1564_v18 = vsel %vm1562_vm1, %v1549_v9, 0  ;;  %v1567_v19 = vsel %vm1562_vm1, %v1550_v10, 0  ;;  %v2417_v20 = vor.u32 %v2641_v11, %v2416_v7  ;;  %v2645_v7 = vld [vmem:[%s3471_s16 + $0x18] sm:$0xff] }
 0x1e4   :  { %v795_v16 = vpack.c.bf16 %v793_v25, %v793_v25  ;;  %v796_v28 = vpack.c.bf16 %v794_v13, %v794_v13  ;;  %v2205_v25 = vor.u32 %v2586_v22, %v2202_v12  ;;  %v2266_v13 = vld [vmem:[#allocation14 + $0x88] sm:$0xf0]  ;;  %1278 = vmatpush.bf16.msra.mxu3 %v2265_v23  ;;  %v2408_v22 = vld [vmem:[%s3469_s14 + $0x20] sm:$0xf]  ;;  %v2639_v23 = vld [vmem:[%s3469_s14 + $0x24] sm:$0xf0] }
 0x1e5   :  { %v2638_v12 = vld [vmem:[%s3469_s14 + $0x24] sm:$0xf]  ;;  %v2671_v9 = vld [vmem:[%s3468_s13] ss:$0 sm:$0xff] }
 0x1e6   :  { %997 = vmatmul.bf16.vlgmr.msrb.gmra.mxu2 %v795_v16  ;;  %1010 = vmatmul.bf16.vlgmr.msrb.gmra.mxu3 %v796_v28  ;;  %v2654_v6 = vld [vmem:[%s3471_s16 + $0x60] sm:$0xff] }
 0x1e7   :  { %1023 = vmatmul.bf16.vlgmr.msra.gmra.mxu0 %v795_v16  ;;  %1036 = vmatmul.bf16.vlgmr.msra.gmra.mxu1 %v796_v28  ;;  %v2269_v16 = vor.u32 %v2602_v24, %v2266_v13  ;;  %v2625_v28 = vld [vmem:[%s3467_s12 + $0x38] sm:$0xff]  ;;  %v2410_v24 = vld [vmem:[%s3469_s14 + $0x28] sm:$0xf0] }
 0x1e8   :  { %1291 = vmatpush.bf16.msrb.mxu0 %v2205_v25  ;;  %1467 = vmatpush.bf16.msrb.mxu2 %v2625_v28  ;;  %v2409_v25 = vor.u32 %v2639_v23, %v2408_v22  ;;  %v2413_v13 = vor.u32 %v2638_v12, %v2410_v24  ;;  %v1315_v28 = vld [vmem:[#allocation1 + $0x9] sm:$0xff]  ;;  %v1596_v24 = vld [vmem:[%s3470_s15] sm:$0x3] }
 0x1e9   :  { %1304 = vmatpush.bf16.msrb.mxu1 %v2269_v16  ;;  %1480 = vmatpush.bf16.msrb.mxu3 %v2633_v29  ;;  %v1314_v16 = vld [vmem:[#allocation1] sm:$0xff] }
 0x1ea   :  { %1598 = vst [vmem:[#allocation1] ss:$9 sm:$0xff] %v1596_v24 }
 0x1ec   :  { %1468 = vmatpush.bf16.msrb.mxu2 %v2624_v17  ;;  %1572 = vmatpush.bf16.msra.mxu0 %v1564_v18 }
 0x1ed   :  { %1481 = vmatpush.bf16.msrb.mxu3 %v2632_v30  ;;  %1585 = vmatpush.bf16.msra.mxu1 %v1567_v19  ;;  %v1316_v30 = vpack.i.b16 %v1314_v16, %v1314_v16  ;;  %v2643_v16 = vld [vmem:[%s3471_s16 + $0x8] sm:$0xff] }
 0x1f0   :  { %1469 = vmatpush.bf16.msrb.mxu2 %v2623_v31  ;;  %1573 = vmatpush.bf16.msra.mxu0 %v2417_v20  ;;  %v1319_v31 = vpack.i.b16 %v1315_v28, %v1315_v28  ;;  %v2651_v28 = vld [vmem:[%s3471_s16 + $0x48] sm:$0xff] }
 0x1f1   :  { %1482 = vmatpush.bf16.msrb.mxu3 %v2631_v32  ;;  %1586 = vmatpush.bf16.msra.mxu1 %v2421_v21  ;;  %v1318_v32 = vperm.slane %v1316_v30, 0  ;;  %v1599_v30 = vld [vmem:[#allocation1] sm:$0xff] }
 0x1f4   :  { %1470 = vmatpush.bf16.msrb.mxu2 %v2622_v56  ;;  %1574 = vmatpush.bf16.msra.mxu0 %v2409_v25  ;;  %v2644_v25 = vld [vmem:[%s3471_s16 + $0x10] sm:$0xff] }
 0x1f5   :  { %1483 = vmatpush.bf16.msrb.mxu3 %v2630_v57  ;;  %1587 = vmatpush.bf16.msra.mxu1 %v2413_v13  ;;  %v2392_v57 = vld [vmem:[%s3469_s14] sm:$0xf]  ;;  %v2652_v13 = vld [vmem:[%s3471_s16 + $0x50] sm:$0xff] }
 0x1f8   :  { %1471 = vmatpush.bf16.msrb.mxu2 %v2621_v58  ;;  %v2635_v58 = vld [vmem:[%s3469_s14 + $0x4] sm:$0xf0] }
 0x1f9   :  { %1484 = vmatpush.bf16.msrb.mxu3 %v2629_v59  ;;  %v2393_v59 = vor.u32 %v2635_v58, %v2392_v57 }
 0x1fc   :  { %1472 = vmatpush.bf16.msrb.mxu2 %v2620_v60  ;;  %v2634_v60 = vld [vmem:[%s3469_s14 + $0x4] sm:$0xf] }
 0x1fd   :  { %1485 = vmatpush.bf16.msrb.mxu3 %v2628_v61  ;;  %v2394_v61 = vld [vmem:[%s3469_s14 + $0x8] sm:$0xf0] }
 0x200   :  { %1473 = vmatpush.bf16.msrb.mxu2 %v2619_v62  ;;  %v2397_v62 = vor.u32 %v2634_v60, %v2394_v61 }
 0x201   :  { %1486 = vmatpush.bf16.msrb.mxu3 %v2627_v63  ;;  %v2649_v63 = vld [vmem:[%s3471_s16 + $0x38] sm:$0xff] }
 0x204   :  { %1474 = vmatpush.bf16.msrb.mxu2 %v2618_v0  ;;  %v2657_v0 = vld [vmem:[%s3471_s16 + $0x78] sm:$0xff] }
 0x205   :  { %1487 = vmatpush.bf16.msrb.mxu3 %v2626_v1  ;;  %v2648_v1 = vld [vmem:[%s3471_s16 + $0x30] sm:$0xff] }
 0x250   :  { %v1500_v20 = vpop.permute.xlu0 %1499 }
 0x264   :  { %v1024_v33 = vpop.f32.mrf.mxu0  ;;  %v1037_v26 = vpop.f32.mrf.mxu1 }
 0x265   :  { %v1038_v39 = vadd.f32 %v1037_v26, %v1024_v33  ;;  %v1321_v33 = vperm.slane %v1319_v31, 0  ;;  %v1600_v31 = vld [vmem:[#allocation1 + $0x9] sm:$0xff] }
 0x269   :  { %v998_v37 = vpop.f32.mrf.mxu2  ;;  %v1011_v38 = vpop.f32.mrf.mxu3 }
 0x26a   :  { %v1012_v40 = vadd.f32 %v1011_v38, %v998_v37  ;;  %v1324_v37 = vunpack.c.l.bf16 %v1318_v32  ;;  %v1325_v38 = vunpack.c.l.bf16 %v1321_v33  ;;  %v1601_v32 = vpack.i.b16 %v1599_v30, %v1599_v30 }
 0x26b   :  { %v1604_v33 = vpack.i.b16 %v1600_v31, %v1600_v31 }
 0x26c   :  { %v1041_v41 = vpack.c.bf16 %v1038_v39, %v1012_v40  ;;  %v1026_v44 = vpop.f32.mrf.mxu0  ;;  %v1039_v45 = vpop.f32.mrf.mxu1 }
 0x26e   :  { %v1053_v46 = vunpack.c.l.bf16 %v1041_v41  ;;  %v1054_v47 = vunpack.c.h.bf16 %v1041_v41 }
 0x270   :  { %v1057_v48 = vadd.f32 %v1055_v42, %v1053_v46  ;;  %v1058_v49 = vadd.f32 %v1056_v43, %v1054_v47 }
 0x271   :  { %v1000_v50 = vpop.f32.mrf.mxu2  ;;  %v1013_v51 = vpop.f32.mrf.mxu3 }
 0x272   :  { %v1062_v52 = vmax.f32 %v1057_v48, 0.0  ;;  %v1063_v53 = vmax.f32 %v1058_v49, 0.0  ;;  %v2400_v51 = vld [vmem:[%s3469_s14 + $0x10] sm:$0xf] }
 0x274   :  { %v1064_v54 = vpack.c.bf16 %v1062_v52, %v1062_v52  ;;  %v1065_v55 = vpack.c.bf16 %v1063_v53, %v1063_v53  ;;  %v2637_v52 = vld [vmem:[%s3469_s14 + $0x14] sm:$0xf0]  ;;  %v2636_v53 = vld [vmem:[%s3469_s14 + $0x14] sm:$0xf] }
 0x276   :  { %1266 = vmatmul.bf16.vlgmr.msra.gmra.mxu2 %v1064_v54  ;;  %1279 = vmatmul.bf16.vlgmr.msra.gmra.mxu3 %v1065_v55 }
 0x277   :  { %1292 = vmatmul.bf16.vlgmr.msrb.gmra.mxu0 %v1064_v54  ;;  %1305 = vmatmul.bf16.vlgmr.msrb.gmra.mxu1 %v1065_v55  ;;  %v2401_v54 = vor.u32 %v2637_v52, %v2400_v51  ;;  %v2402_v55 = vld [vmem:[%s3469_s14 + $0x18] sm:$0xf0] }
 0x278   :  { %v2405_v56 = vor.u32 %v2636_v53, %v2402_v55 }
 0x279   :  { %1575 = vmatpush.bf16.msra.mxu0 %v2401_v54 }
 0x27a   :  { %1588 = vmatpush.bf16.msra.mxu1 %v2405_v56 }
 0x27d   :  { %1576 = vmatpush.bf16.msra.mxu0 %v2393_v59 }
 0x27e   :  { %1589 = vmatpush.bf16.msra.mxu1 %v2397_v62 }
 0x281   :  { %1752 = vmatpush.bf16.msrb.mxu0 %v2649_v63 }
 0x282   :  { %1765 = vmatpush.bf16.msrb.mxu1 %v2657_v0 }
 0x285   :  { %1753 = vmatpush.bf16.msrb.mxu0 %v2648_v1 }
 0x286   :  { %1766 = vmatpush.bf16.msrb.mxu1 %v2656_v2 }
 0x289   :  { %1754 = vmatpush.bf16.msrb.mxu0 %v2647_v3 }
 0x28a   :  { %1767 = vmatpush.bf16.msrb.mxu1 %v2655_v4 }
 0x28d   :  { %1755 = vmatpush.bf16.msrb.mxu0 %v2646_v5 }
 0x28e   :  { %1768 = vmatpush.bf16.msrb.mxu1 %v2654_v6 }
 0x291   :  { %1756 = vmatpush.bf16.msrb.mxu0 %v2645_v7 }
 0x292   :  { %1769 = vmatpush.bf16.msrb.mxu1 %v2653_v8 }
 0x295   :  { %1757 = vmatpush.bf16.msrb.mxu0 %v2644_v25 }
 0x296   :  { %1770 = vmatpush.bf16.msrb.mxu1 %v2652_v13 }
 0x299   :  { %1758 = vmatpush.bf16.msrb.mxu0 %v2643_v16 }
 0x29a   :  { %1771 = vmatpush.bf16.msrb.mxu1 %v2651_v28 }
 0x2f4   :  { %v1293_v29 = vpop.f32.mrf.mxu0  ;;  %v1306_v17 = vpop.f32.mrf.mxu1 }
 0x2f5   :  { %v1307_v27 = vadd.f32 %v1306_v17, %v1293_v29  ;;  %v2642_v29 = vld [vmem:[%s3471_s16] sm:$0xff] }
 0x2f6   :  { %v2650_v17 = vld [vmem:[%s3471_s16 + $0x40] sm:$0xff]  ;;  %1759 = vmatpush.bf16.msrb.mxu0 %v2642_v29 }
 0x2f7   :  { %1772 = vmatpush.bf16.msrb.mxu1 %v2650_v17 }
 0x2f9   :  { %v1267_v26 = vpop.f32.mrf.mxu2  ;;  %v1280_v34 = vpop.f32.mrf.mxu3 }
 0x2fa   :  { %v1281_v35 = vadd.f32 %v1280_v34, %v1267_v26  ;;  %v1603_v26 = vperm.slane %v1601_v32, 0  ;;  %v1606_v34 = vperm.slane %v1604_v33, 0 }
 0x2fc   :  { %v1310_v36 = vpack.c.bf16 %v1307_v27, %v1281_v35  ;;  %v1295_v39 = vpop.f32.mrf.mxu0  ;;  %v1308_v40 = vpop.f32.mrf.mxu1 }
 0x2fe   :  { %v1322_v41 = vunpack.c.l.bf16 %v1310_v36  ;;  %v1323_v42 = vunpack.c.h.bf16 %v1310_v36 }
 0x300   :  { %v1326_v43 = vadd.f32 %v1324_v37, %v1322_v41  ;;  %v1327_v44 = vadd.f32 %v1325_v38, %v1323_v42  ;;  %v1609_v37 = vunpack.c.l.bf16 %v1603_v26  ;;  %v1610_v38 = vunpack.c.l.bf16 %v1606_v34 }
 0x301   :  { %v1269_v45 = vpop.f32.mrf.mxu2  ;;  %v1282_v46 = vpop.f32.mrf.mxu3 }
 0x302   :  { %v1331_v47 = vmax.f32 %v1326_v43, 0.0  ;;  %v1332_v48 = vmax.f32 %v1327_v44, 0.0 }
 0x304   :  { %v1333_v49 = vpack.c.bf16 %v1331_v47, %v1331_v47  ;;  %v1334_v50 = vpack.c.bf16 %v1332_v48, %v1332_v48 }
 0x306   :  { %1475 = vmatmul.bf16.vlgmr.msrb.gmra.mxu2 %v1333_v49  ;;  %1488 = vmatmul.bf16.vlgmr.msrb.gmra.mxu3 %v1334_v50  ;;  %v2672_v49 = vld [vmem:[%s3472_s17] ss:$0 sm:$0xff] }
 0x389   :  { %v1476_v10 = vpop.f32.mrf.mxu2  ;;  %v1489_v11 = vpop.f32.mrf.mxu3 }
 0x38a   :  { %v1477_v14 = vadd.f32 %v2671_v9, %v1476_v10 }
 0x38c   :  { %v1490_v15 = vadd.f32 %v1489_v11, %v1477_v14 }
 0x38e   :  { %v1493_v18 = vmax.f32 %v1490_v15, 0.0  ;;  %v1778_v19 = vsel %vm1559_vm2, %v1490_v15, 0.0 }
 0x38f   :  { %1781 = vst [vmem:[#allocation17] sm:$0xff] %v1778_v19 }
 0x390   :  { %v1494_v21 = vpack.c.bf16 %v1493_v18, %v1493_v18 }
 0x391   :  { %v1478_v22 = vpop.f32.mrf.mxu2  ;;  %v1491_v23 = vpop.f32.mrf.mxu3 }
 0x392   :  { %v1504_v12 = vsel %vm1501_vm3, %v1494_v21, %v1500_v20 }
 0x393   :  { %2422 = vmatmul.msk.bf16.vlgmr.msra.gmra.mxu0 %vm1559_vm2, %v1504_v12  ;;  %2423 = vmatmul.msk.bf16.vlgmr.msra.gmra.mxu1 %vm1559_vm2, %v1504_v12 }
 0x410   :  { %v1578_v27 = vpop.f32.mrf.mxu0  ;;  %v1591_v35 = vpop.f32.mrf.mxu1 }
 0x411   :  { %v1595_v36 = vpack.c.bf16 %v1591_v35, %v1578_v27 }
 0x413   :  { %v1607_v39 = vunpack.c.l.bf16 %v1595_v36  ;;  %v1608_v40 = vunpack.c.h.bf16 %v1595_v36 }
 0x415   :  { %v1611_v41 = vadd.f32 %v1609_v37, %v1607_v39  ;;  %v1612_v42 = vadd.f32 %v1610_v38, %v1608_v40 }
 0x417   :  { %v1616_v43 = vmax.f32 %v1611_v41, 0.0  ;;  %v1617_v44 = vmax.f32 %v1612_v42, 0.0 }
 0x418   :  { %v1580_v45 = vpop.f32.mrf.mxu0  ;;  %v1593_v46 = vpop.f32.mrf.mxu1 }
 0x419   :  { %v1618_v47 = vpack.c.bf16 %v1616_v43, %v1616_v43  ;;  %v1619_v48 = vpack.c.bf16 %v1617_v44, %v1617_v44 }
 0x41b   :  { %1760 = vmatmul.bf16.vlgmr.msrb.gmra.mxu0 %v1618_v47  ;;  %1773 = vmatmul.bf16.vlgmr.msrb.gmra.mxu1 %v1619_v48 }
 0x498   :  { %v1761_v50 = vpop.f32.mrf.mxu0  ;;  %v1774_v51 = vpop.f32.mrf.mxu1 }
 0x499   :  { %v1762_v52 = vadd.f32 %v2672_v49, %v1761_v50 }
 0x49b   :  { %v1775_v53 = vadd.f32 %v1774_v51, %v1762_v52 }
 0x49d   :  { %v1780_v54 = vsel %vm1779_vm4, %v1775_v53, 0.0 }
 0x49e   :  { %1782 = vst [vmem:[#allocation17 + $0x8] sm:$0xff] %v1780_v54 }
 0x49f   :  { %1793 = dma.vmem_to_hbm [thread:$0]  %s1789_s7, 256, %s1791_s28, [#allocation4]  }
 0x4a0   :  { %v1763_v55 = vpop.f32.mrf.mxu0  ;;  %v1776_v56 = vpop.f32.mrf.mxu1 }
 0x4a1   :  { %2923 = dma.done.wait [#allocation4], 256  }
 0x4a2   :  { %2924 = vsyncadd [#allocation4], 4294967040 }
 0x4a3   :  { %1798 = vsyncpa [#allocation3], 1 }
 0x4a4   :  { %1799 = vsyncpa [#allocation6], 1 }
 0x4a5   :  { %1800 = vsyncpa [#allocation9], 1 }
 0x4a6   :  { %1801 = vsyncpa [#allocation12], 1 }
 0x4a7   :  { %1802 = vsyncpa [#allocation15], 1 }
 0x4a8   :  { %1803 = vsyncpa [#allocation4], 1 }

</bundles_post_ra>
